<compile_context>
chip_gen: v5e
topology: v5e:2x2
jax: 0.10.0
libtpu: 0.0.40
codegen_flags: <defaults>
</compile_context>

<pallas_src>
import functools
import math

import jax
import jax.numpy as jnp
from jax.experimental import pallas as pl
from jax.experimental.pallas import tpu as pltpu

_MIB = 1024 * 1024
_LANE = 128


def _attn_kernel(q_ref, k_ref, v_ref, dist_ref, mask_ref, ctx_ref, attn_ref,
                 *, valid_k, padded_k, mxu_dtype, exp_dtype):
    # q_ref: (1, G, TQ, d_k)  k_ref: (1, G, Lk_p, d_k)  v_ref: (1, G, Lk_p, d_v)
    # dist_ref: (1, 1|G, 1|TQ, 1|Lk_p) float   mask_ref: same dims, int8
    q = q_ref[0]
    k = k_ref[0]
    v = v_ref[0]

    d_k = q.shape[-1]
    # Fold 1/sqrt(d_k) into Q (touches TQ*d_k elems instead of TQ*Lk).
    q = (q * (1.0 / math.sqrt(d_k))).astype(mxu_dtype)

    # scores = (Q / sqrt(d_k)) @ K^T; last-dim contraction (no materialized
    # transpose), f32 accumulation on the MXU.
    scores = jnp.einsum("gqd,gkd->gqk", q, k.astype(mxu_dtype),
                        preferred_element_type=jnp.float32)

    # Distance scaling; dist/mask broadcast in-kernel over any size-1 dims.
    dist = dist_ref[0]
    scores = dist.astype(jnp.float32) * scores

    neg = jnp.float32(-1.0e10)
    mask = mask_ref[0]
    # NOTE: if a bundle dump shows VALU saturating, fold the mask into an
    # additive bias in the wrapper instead of compare+select here.
    scores = jnp.where(mask != 0, neg, scores)

    if padded_k:
        # Key columns added only for lane-dense padding are forced to -1e10;
        # exp underflows to exactly 0, so softmax/context match the unpadded
        # math bit-for-bit in f32.
        col = jax.lax.broadcasted_iota(jnp.int32, scores.shape, dimension=2)
        scores = jnp.where(col >= valid_k, neg, scores)

    # Numerically-stable softmax over keys (full Lk row per step -> identical
    # numerics to the reference, no online-softmax needed).
    m = jnp.max(scores, axis=-1, keepdims=True)
    e = jnp.exp((scores - m).astype(exp_dtype))   # bf16 EUP exp on fast path
    e32 = e.astype(jnp.float32)
    s = jnp.sum(e32, axis=-1, keepdims=True)      # f32 row-sum accumulation
    # EUP reciprocal seed + one Newton step on the tiny (G, TQ, 1) tensor.
    inv = pl.reciprocal(s, approx=True)
    inv = inv * (jnp.float32(2.0) - s * inv)
    attn = e32 * inv

    ctx = jnp.einsum("gqk,gkd->gqd", attn.astype(mxu_dtype), v.astype(mxu_dtype),
                     preferred_element_type=jnp.float32)

    ctx_ref[0] = ctx.astype(ctx_ref.dtype)
    attn_ref[0] = attn.astype(attn_ref.dtype)


def _round_up(x, m):
    return ((x + m - 1) // m) * m


def _pad_axis(x, axis, new_size, value=0):
    axis = axis % x.ndim
    pad = new_size - x.shape[axis]
    if pad <= 0:
        return x
    widths = [(0, 0)] * x.ndim
    widths[axis] = (0, pad)
    return jnp.pad(x, widths, constant_values=value)


def _normalize_bcast(x, B, H, Lq, Lk, name):
    """Bring x to 4D, keeping size-1 broadcast dims UN-materialized."""
    x = jnp.asarray(x)
    if x.ndim > 4:
        raise ValueError(f"{name} must have ndim <= 4")
    x = x.reshape((1,) * (4 - x.ndim) + x.shape)
    for dim, full in zip(x.shape, (B, H, Lq, Lk)):
        if dim not in (1, full):
            raise ValueError(f"{name} is not broadcastable to the score shape")
    return x


def _divisors_desc(n):
    return [d for d in range(n, 0, -1) if n % d == 0]


def _select_tiles(B, H, Lq, Lk_p, d_k, d_v, in_b, out_b, dist_b,
                  dist_shape, mask_shape, budget):
    """Pick (head-group size G, query tile TQ) under a total VMEM budget.

    The footprint counts double-buffering (x2) on every pipelined in/out
    block, ~4 score-sized f32 temporaries live in the kernel body, and a
    fixed compiler-scratch allowance.
    """
    cands = [Lq] + [t for t in (512, 384, 256, 128, 64, 32, 16, 8) if t < Lq]

    def bcast_block_elems(shape, G, TQ):
        _, Hx, Qx, Kx = shape
        return ((G if Hx == H else 1)
                * (TQ if Qx != 1 else 1)
                * (Lk_p if Kx != 1 else 1))

    def footprint(G, TQ):
        q = G * TQ * d_k * in_b
        k = G * Lk_p * d_k * in_b
        v = G * Lk_p * d_v * in_b
        d = bcast_block_elems(dist_shape, G, TQ) * dist_b
        m = bcast_block_elems(mask_shape, G, TQ) * 1            # int8 mask
        c = G * TQ * d_v * out_b
        a = G * TQ * Lk_p * out_b
        temps = 4 * G * TQ * Lk_p * 4     # scores / exp / attn / upcasts (f32)
        scratch = 2 * _MIB                # compiler-internal scratch headroom
        return 2 * (q + k + v + d + m + c + a) + temps + scratch

    # 1) Largest head group that fits with a reasonable query tile, so the
    #    batched MXU matmuls stay large and K/V are streamed once per group.
    tq_floor = Lq if Lq <= 128 else 128
    G = 1
    for g in _divisors_desc(H):
        if footprint(g, tq_floor) <= budget:
            G = g
            break

    # 2) Megacore: keep >= 2 grid steps on the parallel (batch, head-group)
    #    axes so the second TensorCore on v7x is not idle.
    if B * (H // G) < 2 and H > 1:
        G = max(d for d in _divisors_desc(H) if d < H)

    # 3) Largest query tile that still fits for the chosen head group.
    TQ = cands[-1]
    for t in cands:
        if footprint(G, t) <= budget:
            TQ = t
            break
    return G, TQ


def distance_scaled_dot_attention(Q, K, V, dist_factor, attn_mask, *,
                                  use_bf16_compute=None):
    """JAX/Pallas equivalent of DistanceScaledDotAttention.forward.

    use_bf16_compute: None -> auto (enabled only when inputs are already
    sub-f32).  Pass True on v6e/v7x to use bf16 MXU matmuls + bf16 EUP exp
    (f32 accumulation) for ~2-3x compute throughput at ~1e-2 precision.
    """
    Q = jnp.asarray(Q)
    K = jnp.asarray(K)
    V = jnp.asarray(V)
    B, H, Lq, d_k = Q.shape
    Lk = K.shape[-2]
    d_v = V.shape[-1]

    out_dtype = jnp.result_type(Q.dtype, K.dtype, V.dtype)
    Q = Q.astype(out_dtype)
    K = K.astype(out_dtype)
    V = V.astype(out_dtype)

    if use_bf16_compute is None:
        use_bf16_compute = jnp.dtype(out_dtype).itemsize < 4
    if use_bf16_compute:
        mxu_dtype = jnp.bfloat16
        exp_dtype = jnp.bfloat16
    else:
        mxu_dtype = out_dtype if jnp.dtype(out_dtype).itemsize < 4 else jnp.float32
        exp_dtype = jnp.float32

    dist = _normalize_bcast(dist_factor, B, H, Lq, Lk, "dist_factor")
    dist = dist.astype(jnp.bfloat16 if use_bf16_compute else out_dtype)
    mask = (_normalize_bcast(attn_mask, B, H, Lq, Lk, "attn_mask") != 0
            ).astype(jnp.int8)

    # ---- lane-dense key padding (attn is the largest HBM stream) ----------
    Lk_p = Lk
    if Lk % _LANE != 0:
        rounded = _round_up(Lk, _LANE)
        if rounded <= 2 * Lk:          # only if padding overhead is modest
            Lk_p = rounded
    if Lk_p != Lk:
        K = _pad_axis(K, -2, Lk_p)
        V = _pad_axis(V, -2, Lk_p)
        if dist.shape[-1] != 1:
            dist = _pad_axis(dist, -1, Lk_p)
        if mask.shape[-1] != 1:
            mask = _pad_axis(mask, -1, Lk_p, value=1)
    # TODO(synk): ctx's last dim (d_v) is left un-padded; pad it too if a
    # profile shows the ctx writeback's masked stores are significant.

    # ---- VMEM budget / tile selection --------------------------------------
    try:
        vmem_cap = int(pltpu.get_tpu_info().vmem_capacity_bytes)
    except Exception:  # pragma: no cover - conservative fallback
        vmem_cap = 128 * _MIB
    # Leave headroom below physical VMEM (v7x: 64 MiB -> 56 MiB limit;
    # v5e/v6e: 128 MiB -> 100 MiB limit).
    vmem_limit = max(32 * _MIB, min(vmem_cap - 8 * _MIB, 100 * _MIB))
    budget = int(0.85 * vmem_limit)

    in_b = jnp.dtype(out_dtype).itemsize
    out_b = jnp.dtype(out_dtype).itemsize
    dist_b = jnp.dtype(dist.dtype).itemsize

    G, TQ = _select_tiles(B, H, Lq, Lk_p, d_k, d_v, in_b, out_b, dist_b,
                          dist.shape, mask.shape, budget)
    n_hg = H // G

    # ---- query padding so the q-tile divides Lq -----------------------------
    Lq_p = Lq if TQ == Lq else _round_up(Lq, TQ)
    if Lq_p != Lq:
        Q = _pad_axis(Q, -2, Lq_p)
        if dist.shape[-2] != 1:
            dist = _pad_axis(dist, -2, Lq_p)
        if mask.shape[-2] != 1:
            mask = _pad_axis(mask, -2, Lq_p)
    n_qt = Lq_p // TQ

    Bd, Hd, Qd, Kd = dist.shape
    Bm, Hm, Qm, Km = mask.shape

    def q_idx(b, g, qt):
        return (b, g, qt, 0)

    def kv_idx(b, g, qt):
        # Independent of the (innermost) q-tile index -> K/V stay resident in
        # VMEM across q tiles, no re-DMA.
        return (b, g, 0, 0)

    def bcast_idx(Bx, Hx, Qx):
        def idx(b, g, qt):
            return (b if Bx == B else 0,
                    g if Hx == H else 0,
                    qt if Qx != 1 else 0,
                    0)
        return idx

    dist_block = (1, G if Hd == H else 1, TQ if Qd != 1 else 1,
                  Lk_p if Kd != 1 else 1)
    mask_block = (1, G if Hm == H else 1, TQ if Qm != 1 else 1,
                  Lk_p if Km != 1 else 1)

    kernel = functools.partial(
        _attn_kernel,
        valid_k=Lk,
        padded_k=(Lk_p != Lk),
        mxu_dtype=mxu_dtype,
        exp_dtype=exp_dtype,
    )

    ctx, attn = pl.pallas_call(
        kernel,
        out_shape=(
            jax.ShapeDtypeStruct((B, H, Lq_p, d_v), out_dtype),
            jax.ShapeDtypeStruct((B, H, Lq_p, Lk_p), out_dtype),
        ),
        grid_spec=pltpu.PrefetchScalarGridSpec(
            num_scalar_prefetch=0,
            grid=(B, n_hg, n_qt),
            in_specs=[
                pl.BlockSpec((1, G, TQ, d_k), q_idx),
                pl.BlockSpec((1, G, Lk_p, d_k), kv_idx),
                pl.BlockSpec((1, G, Lk_p, d_v), kv_idx),
                pl.BlockSpec(dist_block, bcast_idx(Bd, Hd, Qd)),
                pl.BlockSpec(mask_block, bcast_idx(Bm, Hm, Qm)),
            ],
            out_specs=[
                pl.BlockSpec((1, G, TQ, d_v), q_idx),
                pl.BlockSpec((1, G, TQ, Lk_p), q_idx),
            ],
        ),
        compiler_params=pltpu.CompilerParams(
            dimension_semantics=("parallel", "parallel", "arbitrary"),
            vmem_limit_bytes=int(vmem_limit),
        ),
    )(Q, K, V, dist, mask)

    if Lq_p != Lq:
        ctx = ctx[:, :, :Lq, :]
    if Lq_p != Lq or Lk_p != Lk:
        attn = attn[:, :, :Lq, :Lk]
    return ctx, attn


def _reference(Q, K, V, dist_factor, attn_mask):
    d_k = K.shape[-1]
    scores = jnp.einsum("bhqd,bhkd->bhqk", Q, K,
                        precision=jax.lax.Precision.HIGHEST)
    scores = scores / jnp.sqrt(jnp.float32(d_k))
    scores = jnp.asarray(dist_factor) * scores
    scores = jnp.where(attn_mask, jnp.float32(-1.0e10), scores)
    attn = jax.nn.softmax(scores, axis=-1)
    ctx = jnp.einsum("bhqk,bhkd->bhqd", attn, V,
                     precision=jax.lax.Precision.HIGHEST)
    return ctx, attn


if __name__ == "__main__":
    B, H, Lq, Lk, d_k, d_v = 2, 4, 64, 64, 32, 32
    key = jax.random.PRNGKey(0)
    kq, kk, kv, kd, km = jax.random.split(key, 5)

    Q = jax.random.normal(kq, (B, H, Lq, d_k), dtype=jnp.float32)
    K = jax.random.normal(kk, (B, H, Lk, d_k), dtype=jnp.float32)
    V = jax.random.normal(kv, (B, H, Lk, d_v), dtype=jnp.float32)
    # Distance factor / mask at their natural per-batch shape [B, 1, Lq, Lk]
    # (shared across heads) -- the kernel never materializes the H broadcast.
    dist_factor = jax.random.uniform(
        kd, (B, 1, Lq, Lk), dtype=jnp.float32, minval=0.5, maxval=1.5)
    attn_mask = jax.random.bernoulli(km, 0.2, (B, 1, Lq, Lk))
    # Keep the diagonal unmasked so every row has at least one valid entry.
    eye = jnp.eye(Lq, Lk, dtype=bool)[None, None]
    attn_mask = jnp.logical_and(attn_mask, jnp.logical_not(eye))

    # Exact (f32) path.
    ctx, attn = distance_scaled_dot_attention(Q, K, V, dist_factor, attn_mask)
    jax.block_until_ready((ctx, attn))

    ctx_ref, attn_ref = _reference(Q, K, V, dist_factor, attn_mask)
    assert ctx.shape == ctx_ref.shape and attn.shape == attn_ref.shape
    assert jnp.allclose(ctx, ctx_ref, atol=1e-4, rtol=1e-4)
    assert jnp.allclose(attn, attn_ref, atol=1e-4, rtol=1e-4)

    # Reduced-precision fast path (bf16 MXU + bf16 EUP exp, f32 accumulation)
    # intended for v6e/v7x; verified at a looser tolerance.
    ctx_f, attn_f = distance_scaled_dot_attention(
        Q, K, V, dist_factor, attn_mask, use_bf16_compute=True)
    jax.block_until_ready((ctx_f, attn_f))
    assert jnp.allclose(ctx_f, ctx_ref, atol=1e-1, rtol=1e-1)
    assert jnp.allclose(attn_f, attn_ref, atol=1e-1, rtol=1e-1)

    print("KERNEL_OK")
</pallas_src>

<mosaic_0001>
module attributes {stable_mosaic.version = 11 : i64} {
  func.func @_attn_kernel(%arg0: i32, %arg1: i32, %arg2: i32, %arg3: memref<1x4x64x32xf32, #tpu.memory_space<vmem>>, %arg4: memref<1x4x128x32xf32, #tpu.memory_space<vmem>>, %arg5: memref<1x4x128x32xf32, #tpu.memory_space<vmem>>, %arg6: memref<1x1x64x128xf32, #tpu.memory_space<vmem>>, %arg7: memref<1x1x64x128xi8, #tpu.memory_space<vmem>>, %arg8: memref<1x4x64x32xf32, #tpu.memory_space<vmem>>, %arg9: memref<1x4x64x128xf32, #tpu.memory_space<vmem>>) attributes {dimension_semantics = [#tpu.dimension_semantics<parallel>, #tpu.dimension_semantics<parallel>, #tpu.dimension_semantics<arbitrary>], iteration_bounds = array<i64: 2, 1, 1>, scalar_prefetch = 0 : i64, scratch_operands = 0 : i64, tpu.core_type = #tpu.core_type<tc>, window_params = [{transform_indices = @transform_0, window_bounds = array<i64: 1, 4, 64, 32>}, {transform_indices = @transform_1, window_bounds = array<i64: 1, 4, 128, 32>}, {transform_indices = @transform_2, window_bounds = array<i64: 1, 4, 128, 32>}, {transform_indices = @transform_3, window_bounds = array<i64: 1, 1, 64, 128>}, {transform_indices = @transform_4, window_bounds = array<i64: 1, 1, 64, 128>}, {transform_indices = @transform_5, window_bounds = array<i64: 1, 4, 64, 32>}, {transform_indices = @transform_6, window_bounds = array<i64: 1, 4, 64, 128>}]} {
    %c0 = arith.constant 0 : index
    %c0_0 = arith.constant 0 : index
    %c0_1 = arith.constant 0 : index
    %c0_2 = arith.constant 0 : index
    %0 = vector.load %arg3[%c0, %c0_0, %c0_1, %c0_2] : memref<1x4x64x32xf32, #tpu.memory_space<vmem>>, vector<1x4x64x32xf32>
    %1 = vector.shape_cast %0 : vector<1x4x64x32xf32> to vector<4x64x32xf32>
    %c0_3 = arith.constant 0 : index
    %c0_4 = arith.constant 0 : index
    %c0_5 = arith.constant 0 : index
    %c0_6 = arith.constant 0 : index
    %2 = vector.load %arg4[%c0_3, %c0_4, %c0_5, %c0_6] : memref<1x4x128x32xf32, #tpu.memory_space<vmem>>, vector<1x4x128x32xf32>
    %3 = vector.shape_cast %2 : vector<1x4x128x32xf32> to vector<4x128x32xf32>
    %c0_7 = arith.constant 0 : index
    %c0_8 = arith.constant 0 : index
    %c0_9 = arith.constant 0 : index
    %c0_10 = arith.constant 0 : index
    %4 = vector.load %arg5[%c0_7, %c0_8, %c0_9, %c0_10] : memref<1x4x128x32xf32, #tpu.memory_space<vmem>>, vector<1x4x128x32xf32>
    %5 = vector.shape_cast %4 : vector<1x4x128x32xf32> to vector<4x128x32xf32>
    %cst = arith.constant 0.176776692 : f32
    %6 = vector.broadcast %cst : f32 to vector<4x64x32xf32>
    %7 = arith.mulf %1, %6 : vector<4x64x32xf32>
    "tpu.trace_start"() <{level = 10 : i32, message = "gqd,gkd->gqk"}> : () -> ()
    %cst_11 = arith.constant dense<0.000000e+00> : vector<4x64x128xf32>
    %8 = tpu.matmul %7, %3, %cst_11 {dimension_numbers = #tpu.dot_dimension_numbers<[2], [2], [1], [1], [0, 0, 0, 1, 1, 1], [0], [0]>} : vector<4x64x32xf32>, vector<4x128x32xf32>, vector<4x64x128xf32> -> vector<4x64x128xf32>
    "tpu.trace_stop"() : () -> ()
    %c0_12 = arith.constant 0 : index
    %c0_13 = arith.constant 0 : index
    %c0_14 = arith.constant 0 : index
    %c0_15 = arith.constant 0 : index
    %9 = vector.load %arg6[%c0_12, %c0_13, %c0_14, %c0_15] : memref<1x1x64x128xf32, #tpu.memory_space<vmem>>, vector<1x1x64x128xf32>
    %10 = vector.shape_cast %9 : vector<1x1x64x128xf32> to vector<1x64x128xf32>
    %11 = vector.broadcast %10 : vector<1x64x128xf32> to vector<4x64x128xf32>
    %12 = arith.mulf %11, %8 : vector<4x64x128xf32>
    %c0_16 = arith.constant 0 : index
    %c0_17 = arith.constant 0 : index
    %c0_18 = arith.constant 0 : index
    %c0_19 = arith.constant 0 : index
    %13 = vector.load %arg7[%c0_16, %c0_17, %c0_18, %c0_19] : memref<1x1x64x128xi8, #tpu.memory_space<vmem>>, vector<1x1x64x128xi8>
    %14 = vector.shape_cast %13 : vector<1x1x64x128xi8> to vector<1x64x128xi8>
    %c0_i8 = arith.constant 0 : i8
    %15 = vector.broadcast %c0_i8 : i8 to vector<1x64x128xi8>
    %16 = arith.cmpi ne, %14, %15 : vector<1x64x128xi8>
    %cst_20 = arith.constant -1.000000e+10 : f32
    %17 = vector.shape_cast %16 : vector<1x64x128xi1> to vector<1x64x128xi1>
    %18 = vector.broadcast %17 : vector<1x64x128xi1> to vector<4x64x128xi1>
    %19 = vector.broadcast %cst_20 : f32 to vector<4x64x128xf32>
    %20 = arith.select %18, %19, %12 : vector<4x64x128xi1>, vector<4x64x128xf32>
    %21 = tpu.iota {dimensions = array<i32: 2>} : vector<4x64x128xi32>
    %c64_i32 = arith.constant 64 : i32
    %22 = vector.broadcast %c64_i32 : i32 to vector<4x64x128xi32>
    %23 = arith.cmpi sge, %21, %22 : vector<4x64x128xi32>
    %cst_21 = arith.constant -1.000000e+10 : f32
    %24 = vector.broadcast %cst_21 : f32 to vector<4x64x128xf32>
    %25 = arith.select %23, %24, %20 : vector<4x64x128xi1>, vector<4x64x128xf32>
    %cst_22 = arith.constant dense<0xFF800000> : vector<4x64xf32>
    %26 = vector.multi_reduction <maximumf>, %25, %cst_22 [2] : vector<4x64x128xf32> to vector<4x64xf32>
    %27 = vector.shape_cast %26 : vector<4x64xf32> to vector<4x64x1xf32>
    %28 = vector.broadcast %27 : vector<4x64x1xf32> to vector<4x64x128xf32>
    %29 = arith.subf %25, %28 : vector<4x64x128xf32>
    %30 = math.exp %29 : vector<4x64x128xf32>
    %cst_23 = arith.constant dense<0.000000e+00> : vector<4x64xf32>
    %31 = vector.multi_reduction <add>, %30, %cst_23 [2] : vector<4x64x128xf32> to vector<4x64xf32>
    %32 = vector.shape_cast %31 : vector<4x64xf32> to vector<4x64x1xf32>
    %33 = tpu.reciprocal %32 {approx = true} : vector<4x64x1xf32> -> vector<4x64x1xf32>
    %34 = arith.mulf %32, %33 : vector<4x64x1xf32>
    %cst_24 = arith.constant 2.000000e+00 : f32
    %35 = vector.broadcast %cst_24 : f32 to vector<4x64x1xf32>
    %36 = arith.subf %35, %34 : vector<4x64x1xf32>
    %37 = arith.mulf %33, %36 : vector<4x64x1xf32>
    %38 = vector.broadcast %37 : vector<4x64x1xf32> to vector<4x64x128xf32>
    %39 = arith.mulf %30, %38 : vector<4x64x128xf32>
    "tpu.trace_start"() <{level = 10 : i32, message = "gqk,gkd->gqd"}> : () -> ()
    %cst_25 = arith.constant dense<0.000000e+00> : vector<4x64x32xf32>
    %40 = tpu.matmul %39, %5, %cst_25 {dimension_numbers = #tpu.dot_dimension_numbers<[2], [1], [1], [2], [0, 0, 0, 1, 1, 2], [0], [0]>} : vector<4x64x128xf32>, vector<4x128x32xf32>, vector<4x64x32xf32> -> vector<4x64x32xf32>
    "tpu.trace_stop"() : () -> ()
    %c0_26 = arith.constant 0 : index
    %c0_27 = arith.constant 0 : index
    %c0_28 = arith.constant 0 : index
    %c0_29 = arith.constant 0 : index
    %41 = vector.load %arg8[%c0_26, %c0_27, %c0_28, %c0_29] : memref<1x4x64x32xf32, #tpu.memory_space<vmem>>, vector<1x4x64x32xf32>
    %42 = vector.shape_cast %41 : vector<1x4x64x32xf32> to vector<4x64x32xf32>
    %43 = vector.shape_cast %40 : vector<4x64x32xf32> to vector<1x4x64x32xf32>
    tpu.vector_store %arg8[%c0_26, %c0_27, %c0_28, %c0_29], %43 {strides = array<i32>} : memref<1x4x64x32xf32, #tpu.memory_space<vmem>>, vector<1x4x64x32xf32>,
    %c0_30 = arith.constant 0 : index
    %c0_31 = arith.constant 0 : index
    %c0_32 = arith.constant 0 : index
    %c0_33 = arith.constant 0 : index
    %44 = vector.load %arg9[%c0_30, %c0_31, %c0_32, %c0_33] : memref<1x4x64x128xf32, #tpu.memory_space<vmem>>, vector<1x4x64x128xf32>
    %45 = vector.shape_cast %44 : vector<1x4x64x128xf32> to vector<4x64x128xf32>
    %46 = vector.shape_cast %39 : vector<4x64x128xf32> to vector<1x4x64x128xf32>
    tpu.vector_store %arg9[%c0_30, %c0_31, %c0_32, %c0_33], %46 {strides = array<i32>} : memref<1x4x64x128xf32, #tpu.memory_space<vmem>>, vector<1x4x64x128xf32>,
    return
  }
  func.func @transform_0(%arg0: i32, %arg1: i32, %arg2: i32) -> (i32, i32, i32, i32) {
    %c0_i32 = arith.constant 0 : i32
    %c0_i32_0 = arith.constant 0 : i32
    return %arg0, %arg1, %arg2, %c0_i32 : i32, i32, i32, i32
  }
  func.func @transform_1(%arg0: i32, %arg1: i32, %arg2: i32) -> (i32, i32, i32, i32) {
    %c0_i32 = arith.constant 0 : i32
    %c0_i32_0 = arith.constant 0 : i32
    %c0_i32_1 = arith.constant 0 : i32
    return %arg0, %arg1, %c0_i32, %c0_i32_0 : i32, i32, i32, i32
  }
  func.func @transform_2(%arg0: i32, %arg1: i32, %arg2: i32) -> (i32, i32, i32, i32) {
    %c0_i32 = arith.constant 0 : i32
    %c0_i32_0 = arith.constant 0 : i32
    %c0_i32_1 = arith.constant 0 : i32
    return %arg0, %arg1, %c0_i32, %c0_i32_0 : i32, i32, i32, i32
  }
  func.func @transform_3(%arg0: i32, %arg1: i32, %arg2: i32) -> (i32, i32, i32, i32) {
    %c0_i32 = arith.constant 0 : i32
    %c0_i32_0 = arith.constant 0 : i32
    %c0_i32_1 = arith.constant 0 : i32
    return %arg0, %c0_i32, %arg2, %c0_i32_0 : i32, i32, i32, i32
  }
  func.func @transform_4(%arg0: i32, %arg1: i32, %arg2: i32) -> (i32, i32, i32, i32) {
    %c0_i32 = arith.constant 0 : i32
    %c0_i32_0 = arith.constant 0 : i32
    %c0_i32_1 = arith.constant 0 : i32
    return %arg0, %c0_i32, %arg2, %c0_i32_0 : i32, i32, i32, i32
  }
  func.func @transform_5(%arg0: i32, %arg1: i32, %arg2: i32) -> (i32, i32, i32, i32) {
    %c0_i32 = arith.constant 0 : i32
    %c0_i32_0 = arith.constant 0 : i32
    return %arg0, %arg1, %arg2, %c0_i32 : i32, i32, i32, i32
  }
  func.func @transform_6(%arg0: i32, %arg1: i32, %arg2: i32) -> (i32, i32, i32, i32) {
    %c0_i32 = arith.constant 0 : i32
    %c0_i32_0 = arith.constant 0 : i32
    return %arg0, %arg1, %arg2, %c0_i32 : i32, i32, i32, i32
  }
}

</mosaic_0001>

<bundles_post_ra>
// kernel: tpu_custom_call.1
= control target key start
LH: loop header
LB: loop body
LE: loop exit
PB: predicated region body
PF: predicated region fallthrough
CT: control target
= control target key end

     0   :  { %s3570_s0 = inlined_call_operand.vmem [shape: f32[2,4,64,32], index: 0, kind: input, shape index: {}]   ;;  %s3571_s1 = inlined_call_operand.vmem [shape: f32[2,4,128,32], index: 1, kind: input, shape index: {}]   ;;  %s3572_s2 = inlined_call_operand.vmem [shape: f32[2,4,128,32], index: 2, kind: input, shape index: {}]   ;;  %s3573_s3 = inlined_call_operand.vmem [shape: f32[2,1,64,128], index: 3, kind: input, shape index: {}]   ;;  %s3574_s4 = inlined_call_operand.vmem [shape: s8[2,1,64,128], index: 4, kind: input, shape index: {}]   ;;  %s3575_s5 = inlined_call_operand.vmem [shape: f32[2,4,64,32], index: 5, kind: output, shape index: {0}]   ;;  %s3576_s6 = inlined_call_operand.hbm [shape: f32[2,4,64,128], index: 6, kind: output, shape index: {1}]  }
   0x1   :  { %3577 = sst [smem:[#allocation5_spill]] %s3570_s0 }
   0x2   :  { %12 = vsyncpa [#allocation3], 0 }
   0x3   :  { %14 = vsyncpa [#allocation3 + $0x1], 0  ;;  %s2629_s21 = smov 0   ;;  %s2631_s22 = smov 0  }
   0x4   :  { %s2633_s23 = smov 0   ;;  %s2635_s24 = smov 0  }
   0x5   :  { %s2637_s25 = smov 0   ;;  %s2639_s26 = smov 0  }
   0x6 LB: > { %s2199_s27 = sadd.s32 4294967295, %s2589_s26   ;;  %s2200_s28 = sadd.s32 4294967294, %s2589_s26   ;;  %s2589_s26 = sphi %s2639_s26, %s20_s26   ;;  %s2585_s25 = sphi %s2637_s25, %s3601_s25   ;;  %s2581_s24 = sphi %s2635_s24, %s3600_s24   ;;  %s2577_s23 = sphi %s2633_s23, %s3599_s23   ;;  %s2573_s22 = sphi %s2631_s22, %s3598_s22   ;;  %s2569_s21 = sphi %s2629_s21, %s3597_s21  }
   0x7   : > { %s39_s29 = sadd.s32 1, %s2585_s25  ;;  %s222_s30 = sadd.s32 1, %s2577_s23 }
   0x8   : > { %p41_p0 = scmp.ge.s32.totalorder %s39_s29, 2  ;;  %p232_p1 = scmp.ne.s32.totalorder %s2577_s23, %s2573_s22 }
   0x9   : > { %p233_p2 = scmp.eq.s32.totalorder %s2199_s27, 1  ;;  %p238_p3 = scmp.ne.s32.totalorder %s2573_s22, %s2569_s21 }
   0xa   : > { %s3603_s29 = smov (%p41_p0, %s39_s29), 0  ;;  %p239_p5 = scmp.eq.s32.totalorder %s2200_s28, 1 }
   0xb   : > { %p2669_p4 = por %p233_p2, %p232_p1  ;;  %s215_s8 = ssub.s32 %s2585_s25, %s3603_s29 }
   0xc   : > { %p2203_p6 = scmp.ge.s32.totalorder %s2589_s26, 1  ;;  %p220_p7 = scmp.eq.s32.totalorder %s215_s8, 0 }
   0xd   : > { %p2676_p8 = por %p239_p5, %p238_p3  ;;  %p330_p9 = scmp.lt.s32.totalorder %s2589_s26, 3 }
   0xe   : > { %s2682_s10 = scalar_select %p220_p7, %s2577_s23, %s222_s30  }
   0xf   : > { %p331_p10 = pnand %p2203_p6, %p330_p9 }
  0x10   : > { %p423_p11 = scmp.lt.s32.totalorder (!%p331_p10), %s2581_s24, 1  ;;  %s3580_s0 = sld [smem:[#allocation5_spill]] (!%p331_p10) }
  0x11   : > { %334 = sbr.rel (%p331_p10) target bundleno = 703 (0x2bf), region = 40  ;;  %s2324_s28 = sshll.u32 (!%p331_p10), %s2581_s24, 8 }
  0x12   : > { %s1977_s13 = scalar_lea.hbm (!%p331_p10), %s3576_s6, %s2324_s28  ;;  %s2531_s28 = scalar_lea.hbm (!%p331_p10), %s3576_s6, 512 }
  0x16   : > { %s2686_s11 = scalar_select %p423_p11, %s2581_s24, 1  ;;  %vm691_vm0 = vcmask 261120  }
  0x18   : > { %s2319_s12 = sshll.u32 %s2686_s11, 9  ;;  %s2318_s16 = sshll.u32 %s2686_s11, 8 }
  0x19   : > { %s2694_s15 = scalar_lea.vmem %s3571_s1, %s2319_s12  ;;  %s2815_s19 = scalar_lea.vmem %s3580_s0, %s2318_s16 }
  0x1a   : > { %v546_v0 = vld [vmem:[%s2694_s15 + $0x78] sm:$0xff]  ;;  %v545_v3 = vld [vmem:[%s2694_s15 + $0x70] sm:$0xff]  ;;  %v544_v8 = vld [vmem:[%s2694_s15 + $0x68] sm:$0xff]  ;;  %s2322_s20 = sshll.u32 %s2686_s11, 4  ;;  %s2321_s8 = sshll.u32 %s2686_s11, 6 }
  0x1b   : > { %v578_v1 = vld [vmem:[%s2694_s15 + $0x178] sm:$0xff]  ;;  %2217 = vmatpush.xpose.msk.msra.mxu0 %vm691_vm0, %v546_v0  ;;  %v577_v4 = vld [vmem:[%s2694_s15 + $0x170] sm:$0xff]  ;;  %v576_v9 = vld [vmem:[%s2694_s15 + $0x168] sm:$0xff]  ;;  %s477_s30 = scalar_lea.vmem %s3574_s4, %s2322_s20 }
  0x1c   : > { %v594_v2 = vld [vmem:[%s2694_s15 + $0x1f8] sm:$0xff]  ;;  %2265 = vmatpush.xpose.msk.msra.mxu2 %vm691_vm0, %v578_v1  ;;  %v593_v6 = vld [vmem:[%s2694_s15 + $0x1f0] sm:$0xff]  ;;  %v592_v10 = vld [vmem:[%s2694_s15 + $0x1e8] sm:$0xff] }
  0x1d   : > { %2289 = vmatpush.xpose.msk.msra.mxu3 %vm691_vm0, %v594_v2  ;;  %v562_v5 = vld [vmem:[%s2694_s15 + $0xf8] sm:$0xff]  ;;  %v561_v7 = vld [vmem:[%s2694_s15 + $0xf0] sm:$0xff]  ;;  %v560_v11 = vld [vmem:[%s2694_s15 + $0xe8] sm:$0xff] }
  0x1e   : > { %2241 = vmatpush.xpose.msk.msra.mxu1 %vm691_vm0, %v562_v5  ;;  %v543_v12 = vld [vmem:[%s2694_s15 + $0x60] sm:$0xff]  ;;  %v542_v16 = vld [vmem:[%s2694_s15 + $0x58] sm:$0xff]  ;;  %v541_v20 = vld [vmem:[%s2694_s15 + $0x50] sm:$0xff] }
  0x1f   : > { %2218 = vmatpush.xpose.msk.msra.mxu0 %vm691_vm0, %v545_v3  ;;  %v575_v13 = vld [vmem:[%s2694_s15 + $0x160] sm:$0xff]  ;;  %v574_v17 = vld [vmem:[%s2694_s15 + $0x158] sm:$0xff]  ;;  %v573_v21 = vld [vmem:[%s2694_s15 + $0x150] sm:$0xff] }
  0x20   : > { %2266 = vmatpush.xpose.msk.msra.mxu2 %vm691_vm0, %v577_v4  ;;  %v591_v14 = vld [vmem:[%s2694_s15 + $0x1e0] sm:$0xff]  ;;  %v590_v18 = vld [vmem:[%s2694_s15 + $0x1d8] sm:$0xff]  ;;  %v589_v22 = vld [vmem:[%s2694_s15 + $0x1d0] sm:$0xff] }
  0x21   : > { %2290 = vmatpush.xpose.msk.msra.mxu3 %vm691_vm0, %v593_v6  ;;  %v559_v15 = vld [vmem:[%s2694_s15 + $0xe0] sm:$0xff]  ;;  %v558_v19 = vld [vmem:[%s2694_s15 + $0xd8] sm:$0xff]  ;;  %v557_v23 = vld [vmem:[%s2694_s15 + $0xd0] sm:$0xff] }
  0x22   : > { %2242 = vmatpush.xpose.msk.msra.mxu1 %vm691_vm0, %v561_v7  ;;  %v540_v24 = vld [vmem:[%s2694_s15 + $0x48] sm:$0xff]  ;;  %v539_v28 = vld [vmem:[%s2694_s15 + $0x40] sm:$0xff]  ;;  %v538_v32 = vld [vmem:[%s2694_s15 + $0x38] sm:$0xff] }
  0x23   : > { %2219 = vmatpush.xpose.msk.msra.mxu0 %vm691_vm0, %v544_v8  ;;  %v572_v25 = vld [vmem:[%s2694_s15 + $0x148] sm:$0xff]  ;;  %v571_v29 = vld [vmem:[%s2694_s15 + $0x140] sm:$0xff]  ;;  %v570_v33 = vld [vmem:[%s2694_s15 + $0x138] sm:$0xff] }
  0x24   : > { %2267 = vmatpush.xpose.msk.msra.mxu2 %vm691_vm0, %v576_v9  ;;  %v588_v26 = vld [vmem:[%s2694_s15 + $0x1c8] sm:$0xff]  ;;  %v587_v30 = vld [vmem:[%s2694_s15 + $0x1c0] sm:$0xff]  ;;  %v586_v34 = vld [vmem:[%s2694_s15 + $0x1b8] sm:$0xff] }
  0x25   : > { %2291 = vmatpush.xpose.msk.msra.mxu3 %vm691_vm0, %v592_v10  ;;  %v556_v27 = vld [vmem:[%s2694_s15 + $0xc8] sm:$0xff]  ;;  %v555_v31 = vld [vmem:[%s2694_s15 + $0xc0] sm:$0xff]  ;;  %v554_v35 = vld [vmem:[%s2694_s15 + $0xb8] sm:$0xff] }
  0x26   : > { %2243 = vmatpush.xpose.msk.msra.mxu1 %vm691_vm0, %v560_v11  ;;  %v537_v36 = vld [vmem:[%s2694_s15 + $0x30] sm:$0xff]  ;;  %v536_v40 = vld [vmem:[%s2694_s15 + $0x28] sm:$0xff]  ;;  %v535_v44 = vld [vmem:[%s2694_s15 + $0x20] sm:$0xff] }
  0x27   : > { %2220 = vmatpush.xpose.msk.msra.mxu0 %vm691_vm0, %v543_v12  ;;  %v569_v37 = vld [vmem:[%s2694_s15 + $0x130] sm:$0xff]  ;;  %v568_v41 = vld [vmem:[%s2694_s15 + $0x128] sm:$0xff]  ;;  %v567_v45 = vld [vmem:[%s2694_s15 + $0x120] sm:$0xff] }
  0x28   : > { %2268 = vmatpush.xpose.msk.msra.mxu2 %vm691_vm0, %v575_v13  ;;  %v585_v38 = vld [vmem:[%s2694_s15 + $0x1b0] sm:$0xff]  ;;  %v584_v42 = vld [vmem:[%s2694_s15 + $0x1a8] sm:$0xff]  ;;  %v583_v46 = vld [vmem:[%s2694_s15 + $0x1a0] sm:$0xff] }
  0x29   : > { %2292 = vmatpush.xpose.msk.msra.mxu3 %vm691_vm0, %v591_v14  ;;  %v553_v39 = vld [vmem:[%s2694_s15 + $0xb0] sm:$0xff]  ;;  %v552_v43 = vld [vmem:[%s2694_s15 + $0xa8] sm:$0xff]  ;;  %v551_v47 = vld [vmem:[%s2694_s15 + $0xa0] sm:$0xff] }
  0x2a   : > { %2244 = vmatpush.xpose.msk.msra.mxu1 %vm691_vm0, %v559_v15  ;;  %v534_v48 = vld [vmem:[%s2694_s15 + $0x18] sm:$0xff]  ;;  %v533_v52 = vld [vmem:[%s2694_s15 + $0x10] sm:$0xff]  ;;  %v532_v56 = vld [vmem:[%s2694_s15 + $0x8] sm:$0xff] }
  0x2b   : > { %2221 = vmatpush.xpose.msk.msra.mxu0 %vm691_vm0, %v542_v16  ;;  %v566_v49 = vld [vmem:[%s2694_s15 + $0x118] sm:$0xff]  ;;  %v565_v53 = vld [vmem:[%s2694_s15 + $0x110] sm:$0xff]  ;;  %v564_v57 = vld [vmem:[%s2694_s15 + $0x108] sm:$0xff] }
  0x2c   : > { %2269 = vmatpush.xpose.msk.msra.mxu2 %vm691_vm0, %v574_v17  ;;  %v582_v50 = vld [vmem:[%s2694_s15 + $0x198] sm:$0xff]  ;;  %v581_v54 = vld [vmem:[%s2694_s15 + $0x190] sm:$0xff]  ;;  %v580_v58 = vld [vmem:[%s2694_s15 + $0x188] sm:$0xff] }
  0x2d   : > { %2293 = vmatpush.xpose.msk.msra.mxu3 %vm691_vm0, %v590_v18  ;;  %v550_v51 = vld [vmem:[%s2694_s15 + $0x98] sm:$0xff]  ;;  %v549_v55 = vld [vmem:[%s2694_s15 + $0x90] sm:$0xff]  ;;  %v548_v59 = vld [vmem:[%s2694_s15 + $0x88] sm:$0xff] }
  0x2e   : > { %2245 = vmatpush.xpose.msk.msra.mxu1 %vm691_vm0, %v558_v19  ;;  %v499_v60 = vld [vmem:[%s2815_s19] sm:$0xff]  ;;  %v516_v8 = vld [vmem:[%s2815_s19 + $0x88] sm:$0xff]  ;;  %v501_v16 = vld [vmem:[%s2815_s19 + $0x10] sm:$0xff] }
  0x2f   : > { %2222 = vmatpush.xpose.msk.msra.mxu0 %vm691_vm0, %v541_v20  ;;  %v515_v61 = vld [vmem:[%s2815_s19 + $0x80] sm:$0xff]  ;;  %v659_v3 = vmul.f32 0.17677669, %v499_v60  ;;  %v500_v9 = vld [vmem:[%s2815_s19 + $0x8] sm:$0xff]  ;;  %v676_v12 = vmul.f32 0.17677669, %v516_v8  ;;  %v1294_v8 = vlaneseq }
  0x30   : > { %2270 = vmatpush.xpose.msk.msra.mxu2 %vm691_vm0, %v573_v21  ;;  %v531_v62 = vld [vmem:[%s2694_s15] sm:$0xff]  ;;  %v675_v4 = vmul.f32 0.17677669, %v515_v61  ;;  %v524_v10 = vld [vmem:[%s2815_s19 + $0xc8] sm:$0xff]  ;;  %v660_v13 = vmul.f32 0.17677669, %v500_v9 }
  0x31   : > { %2294 = vmatpush.xpose.msk.msra.mxu3 %vm691_vm0, %v589_v22  ;;  %v563_v63 = vld [vmem:[%s2694_s15 + $0x100] sm:$0xff]  ;;  %v508_v11 = vld [vmem:[%s2815_s19 + $0x48] sm:$0xff]  ;;  %v684_v14 = vmul.f32 0.17677669, %v524_v10  ;;  %v517_v17 = vld [vmem:[%s2815_s19 + $0x90] sm:$0xff] }
  0x32   : > { %2246 = vmatpush.xpose.msk.msra.mxu1 %vm691_vm0, %v557_v23  ;;  %v523_v0 = vld [vmem:[%s2815_s19 + $0xc0] sm:$0xff]  ;;  %v668_v15 = vmul.f32 0.17677669, %v508_v11  ;;  %v525_v18 = vld [vmem:[%s2815_s19 + $0xd0] sm:$0xff]  ;;  %v661_v20 = vmul.f32 0.17677669, %v501_v16 }
  0x33   : > { %2223 = vmatpush.xpose.msk.msra.mxu0 %vm691_vm0, %v540_v24  ;;  %v579_v1 = vld [vmem:[%s2694_s15 + $0x180] sm:$0xff]  ;;  %v683_v6 = vmul.f32 0.17677669, %v523_v0  ;;  %v509_v19 = vld [vmem:[%s2815_s19 + $0x50] sm:$0xff]  ;;  %v677_v21 = vmul.f32 0.17677669, %v517_v17 }
  0x34   : > { %2271 = vmatpush.xpose.msk.msra.mxu2 %vm691_vm0, %v572_v25  ;;  %v507_v2 = vld [vmem:[%s2815_s19 + $0x40] sm:$0xff]  ;;  %v685_v22 = vmul.f32 0.17677669, %v525_v18  ;;  %v669_v23 = vmul.f32 0.17677669, %v509_v19  ;;  %v518_v24 = vld [vmem:[%s2815_s19 + $0x98] sm:$0xff] }
  0x35   : > { %2295 = vmatpush.xpose.msk.msra.mxu3 %vm691_vm0, %v588_v26  ;;  %v547_v5 = vld [vmem:[%s2694_s15 + $0x80] sm:$0xff]  ;;  %v667_v7 = vmul.f32 0.17677669, %v507_v2  ;;  %v502_v25 = vld [vmem:[%s2815_s19 + $0x18] sm:$0xff]  ;;  %s2906_s15 = scalar_lea.vmem %s3573_s3, %s2321_s8  ;;  %v2908_v11 = vand.u32 127, %v1294_v8 }
  0x36   : > { %2247 = vmatpush.xpose.msk.msra.mxu1 %vm691_vm0, %v556_v27  ;;  %v526_v26 = vld [vmem:[%s2815_s19 + $0xd8] sm:$0xff]  ;;  %v1184_v0 = vld [vmem:[%s477_s30] sm:$0xff] }
  0x37   : > { %2224 = vmatpush.xpose.msk.msra.mxu0 %vm691_vm0, %v539_v28  ;;  %v510_v27 = vld [vmem:[%s2815_s19 + $0x58] sm:$0xff]  ;;  %v678_v28 = vmul.f32 0.17677669, %v518_v24  ;;  %vm1186_vm1 = vnez %v1184_v0  ;;  %vm1296_vm4 = vcmp.ge.s32.totalorder %v2908_v11, 64 }
  0x38   : > { %2272 = vmatpush.xpose.msk.msra.mxu2 %vm691_vm0, %v571_v29  ;;  %v662_v29 = vmul.f32 0.17677669, %v502_v25 }
  0x39   : > { %2296 = vmatpush.xpose.msk.msra.mxu3 %vm691_vm0, %v587_v30  ;;  %v686_v30 = vmul.f32 0.17677669, %v526_v26 }
  0x3a   : > { %2248 = vmatpush.xpose.msk.msra.mxu1 %vm691_vm0, %v555_v31  ;;  %v670_v31 = vmul.f32 0.17677669, %v510_v27 }
  0x3b   : > { %2225 = vmatpush.xpose.msk.msra.mxu0 %vm691_vm0, %v538_v32  ;;  %v519_v32 = vld [vmem:[%s2815_s19 + $0xa0] sm:$0xff] }
  0x3c   : > { %2273 = vmatpush.xpose.msk.msra.mxu2 %vm691_vm0, %v570_v33  ;;  %v503_v33 = vld [vmem:[%s2815_s19 + $0x20] sm:$0xff] }
  0x3d   : > { %2297 = vmatpush.xpose.msk.msra.mxu3 %vm691_vm0, %v586_v34  ;;  %v527_v34 = vld [vmem:[%s2815_s19 + $0xe0] sm:$0xff] }
  0x3e   : > { %2249 = vmatpush.xpose.msk.msra.mxu1 %vm691_vm0, %v554_v35  ;;  %v511_v35 = vld [vmem:[%s2815_s19 + $0x60] sm:$0xff] }
  0x3f   : > { %2226 = vmatpush.xpose.msk.msra.mxu0 %vm691_vm0, %v537_v36  ;;  %v679_v36 = vmul.f32 0.17677669, %v519_v32  ;;  %v1145_v32 = vld [vmem:[%s2906_s15 + $0x8] sm:$0xff] }
  0x40   : > { %2274 = vmatpush.xpose.msk.msra.mxu2 %vm691_vm0, %v569_v37  ;;  %v663_v37 = vmul.f32 0.17677669, %v503_v33 }
  0x41   : > { %2298 = vmatpush.xpose.msk.msra.mxu3 %vm691_vm0, %v585_v38  ;;  %v687_v38 = vmul.f32 0.17677669, %v527_v34 }
  0x42   : > { %2250 = vmatpush.xpose.msk.msra.mxu1 %vm691_vm0, %v553_v39  ;;  %v671_v39 = vmul.f32 0.17677669, %v511_v35 }
  0x43   : > { %2227 = vmatpush.xpose.msk.msra.mxu0 %vm691_vm0, %v536_v40  ;;  %v504_v40 = vld [vmem:[%s2815_s19 + $0x28] sm:$0xff] }
  0x44   : > { %2275 = vmatpush.xpose.msk.msra.mxu2 %vm691_vm0, %v568_v41  ;;  %v520_v41 = vld [vmem:[%s2815_s19 + $0xa8] sm:$0xff] }
  0x45   : > { %2299 = vmatpush.xpose.msk.msra.mxu3 %vm691_vm0, %v584_v42  ;;  %v528_v42 = vld [vmem:[%s2815_s19 + $0xe8] sm:$0xff] }
  0x46   : > { %2251 = vmatpush.xpose.msk.msra.mxu1 %vm691_vm0, %v552_v43  ;;  %v512_v43 = vld [vmem:[%s2815_s19 + $0x68] sm:$0xff] }
  0x47   : > { %2228 = vmatpush.xpose.msk.msra.mxu0 %vm691_vm0, %v535_v44  ;;  %v664_v44 = vmul.f32 0.17677669, %v504_v40 }
  0x48   : > { %2276 = vmatpush.xpose.msk.msra.mxu2 %vm691_vm0, %v567_v45  ;;  %v680_v45 = vmul.f32 0.17677669, %v520_v41 }
  0x49   : > { %2300 = vmatpush.xpose.msk.msra.mxu3 %vm691_vm0, %v583_v46  ;;  %v688_v46 = vmul.f32 0.17677669, %v528_v42 }
  0x4a   : > { %2252 = vmatpush.xpose.msk.msra.mxu1 %vm691_vm0, %v551_v47  ;;  %v672_v47 = vmul.f32 0.17677669, %v512_v43 }
  0x4b   : > { %2229 = vmatpush.xpose.msk.msra.mxu0 %vm691_vm0, %v534_v48  ;;  %v505_v48 = vld [vmem:[%s2815_s19 + $0x30] sm:$0xff] }
  0x4c   : > { %2277 = vmatpush.xpose.msk.msra.mxu2 %vm691_vm0, %v566_v49  ;;  %v521_v49 = vld [vmem:[%s2815_s19 + $0xb0] sm:$0xff] }
  0x4d   : > { %2301 = vmatpush.xpose.msk.msra.mxu3 %vm691_vm0, %v582_v50  ;;  %v529_v50 = vld [vmem:[%s2815_s19 + $0xf0] sm:$0xff] }
  0x4e   : > { %2253 = vmatpush.xpose.msk.msra.mxu1 %vm691_vm0, %v550_v51  ;;  %v513_v51 = vld [vmem:[%s2815_s19 + $0x70] sm:$0xff] }
  0x4f   : > { %2230 = vmatpush.xpose.msk.msra.mxu0 %vm691_vm0, %v533_v52  ;;  %v665_v52 = vmul.f32 0.17677669, %v505_v48 }
  0x50   : > { %2278 = vmatpush.xpose.msk.msra.mxu2 %vm691_vm0, %v565_v53  ;;  %v681_v53 = vmul.f32 0.17677669, %v521_v49 }
  0x51   : > { %2302 = vmatpush.xpose.msk.msra.mxu3 %vm691_vm0, %v581_v54  ;;  %v689_v54 = vmul.f32 0.17677669, %v529_v50 }
  0x52   : > { %2254 = vmatpush.xpose.msk.msra.mxu1 %vm691_vm0, %v549_v55  ;;  %v673_v55 = vmul.f32 0.17677669, %v513_v51  ;;  %v1146_v51 = vld [vmem:[%s2906_s15 + $0x10] sm:$0xff] }
  0x53   : > { %2231 = vmatpush.xpose.msk.msra.mxu0 %vm691_vm0, %v532_v56  ;;  %v506_v56 = vld [vmem:[%s2815_s19 + $0x38] sm:$0xff] }
  0x54   : > { %2279 = vmatpush.xpose.msk.msra.mxu2 %vm691_vm0, %v564_v57  ;;  %v522_v57 = vld [vmem:[%s2815_s19 + $0xb8] sm:$0xff]  ;;  %v666_v60 = vmul.f32 0.17677669, %v506_v56 }
  0x55   : > { %2303 = vmatpush.xpose.msk.msra.mxu3 %vm691_vm0, %v580_v58  ;;  %v530_v58 = vld [vmem:[%s2815_s19 + $0xf8] sm:$0xff]  ;;  %v682_v61 = vmul.f32 0.17677669, %v522_v57 }
  0x56   : > { %2255 = vmatpush.xpose.msk.msra.mxu1 %vm691_vm0, %v548_v59  ;;  %v514_v59 = vld [vmem:[%s2815_s19 + $0x78] sm:$0xff]  ;;  %s3275_s19 = scalar_lea.vmem %s3572_s2, %s2319_s12  ;;  %s418_s12 = sand.u32 1, %s2573_s22  }
  0x57   : > { %2232 = vmatpush.xpose.msk.msra.mxu0 %vm691_vm0, %v531_v62  ;;  %v690_v62 = vmul.f32 0.17677669, %v530_v58  ;;  %s2204_s20 = sshll.u32 %s418_s12, 8  ;;  %s1956_s17 = scalar_lea.sflag [#allocation3], %s418_s12 }
  0x58   : > { %2280 = vmatpush.xpose.msk.msra.mxu2 %vm691_vm0, %v563_v63  ;;  %v674_v63 = vmul.f32 0.17677669, %v514_v59  ;;  %s3395_s27 = scalar_lea.vmem [#allocation2], %s2204_s20 }
  0x59   : > { %2304 = vmatpush.xpose.msk.msra.mxu3 %vm691_vm0, %v579_v1  ;;  %v2591_v1 = vmov 0   ;;  %s1978_s14 = sshll.u32 %s3395_s27, 4  ;;  %s1979_s14 = int_to_ptr.vmem [resolvable:$true] %s1978_s14 }
  0x5a   : > { %2256 = vmatpush.xpose.msk.msra.mxu1 %vm691_vm0, %v547_v5  ;;  %2233 = vmatmul.msk.f32.vlgmr.msra.gmra.mxu0 %vm691_vm0, %v659_v3  ;;  %v1188_v2 = vsel %vm1186_vm1, 16843009, %v2591_v1 }
  0x5b   : > { %2281 = vmatmul.msk.f32.vlgmr.msra.gmra.mxu2 %vm691_vm0, %v675_v4  ;;  %v1190_v3 = vunpack.c.0.s8 %v1188_v2  ;;  %v1193_v34 = vunpack.c.3.s8 %v1188_v2 }
  0x5c   : > { %2305 = vmatmul.msk.f32.vlgmr.msra.gmra.mxu3 %vm691_vm0, %v683_v6  ;;  %v1191_v6 = vunpack.c.1.s8 %v1188_v2 }
  0x5d   : > { %2257 = vmatmul.msk.f32.vlgmr.msra.gmra.mxu1 %vm691_vm0, %v667_v7  ;;  %v1198_v4 = vpack.c.b16 %v1190_v3, %v1190_v3  ;;  %v1204_v42 = vpack.c.b16 %v1193_v34, %v1193_v34 }
  0x5e   : > { %v1200_v9 = vpack.c.b16 %v1191_v6, %v1191_v6 }
  0x5f   : > { %v1199_v5 = vpack.c.b8 %v1198_v4, %v1198_v4 }
  0x61   : > { %vm1214_vm2 = vnez %v1199_v5 }
  0x62   : > { %2234 = vmatmul.msk.f32.gmra.mxu0 %vm691_vm0, %v660_v13  ;;  %v1222_v7 = vsel %vm1214_vm2, 16843009, %v2591_v1  ;;  %v1192_v13 = vunpack.c.2.s8 %v1188_v2 }
  0x63   : > { %2282 = vmatmul.msk.f32.gmra.mxu2 %vm691_vm0, %v676_v12  ;;  %v1230_v10 = vunpack.c.0.s8 %v1222_v7  ;;  %v1144_v12 = vld [vmem:[%s2906_s15] sm:$0xff] }
  0x64   : > { %2306 = vmatmul.msk.f32.gmra.mxu3 %vm691_vm0, %v684_v14  ;;  %v1201_v14 = vpack.c.b8 %v1200_v9, %v1200_v9  ;;  %v1202_v19 = vpack.c.b16 %v1192_v13, %v1192_v13 }
  0x65   : > { %2258 = vmatmul.msk.f32.gmra.mxu1 %vm691_vm0, %v668_v15  ;;  %vm2911_vm3 = vcmp.ne.s32.totalorder %v1230_v10, 0 }
  0x66   : > { %vm1215_vm5 = vnez %v1201_v14  ;;  %v1203_v26 = vpack.c.b8 %v1202_v19, %v1202_v19  ;;  %v1147_v19 = vld [vmem:[%s2906_s15 + $0x18] sm:$0xff] }
  0x67   : > { %v1223_v25 = vsel %vm1215_vm5, 16843009, %v2591_v1 }
  0x68   : > { %v1231_v33 = vunpack.c.0.s8 %v1223_v25  ;;  %vm1216_vm7 = vnez %v1203_v26 }
  0x69   : > { %v1224_v41 = vsel %vm1216_vm7, 16843009, %v2591_v1 }
  0x6a   : > { %2235 = vmatmul.msk.f32.gmra.mxu0 %vm691_vm0, %v661_v20  ;;  %vm2944_vm8 = vcmp.ne.s32.totalorder %v1231_v33, 0 }
  0x6b   : > { %2283 = vmatmul.msk.f32.gmra.mxu2 %vm691_vm0, %v677_v21 }
  0x6c   : > { %2307 = vmatmul.msk.f32.gmra.mxu3 %vm691_vm0, %v685_v22 }
  0x6d   : > { %2259 = vmatmul.msk.f32.gmra.mxu1 %vm691_vm0, %v669_v23  ;;  %v1185_v23 = vld [vmem:[%s477_s30 + $0x8] sm:$0xff] }
  0x6e   : > { %vm1187_vm6 = vnez %v1185_v23 }
  0x72   : > { %2236 = vmatmul.msk.f32.gmra.mxu0 %vm691_vm0, %v662_v29 }
  0x73   : > { %2284 = vmatmul.msk.f32.gmra.mxu2 %vm691_vm0, %v678_v28 }
  0x74   : > { %2308 = vmatmul.msk.f32.gmra.mxu3 %vm691_vm0, %v686_v30 }
  0x75   : > { %2260 = vmatmul.msk.f32.gmra.mxu1 %vm691_vm0, %v670_v31 }
  0x7a   : > { %2237 = vmatmul.msk.f32.gmra.mxu0 %vm691_vm0, %v663_v37 }
  0x7b   : > { %2285 = vmatmul.msk.f32.gmra.mxu2 %vm691_vm0, %v679_v36 }
  0x7c   : > { %2309 = vmatmul.msk.f32.gmra.mxu3 %vm691_vm0, %v687_v38  ;;  %v2938_v38 = vsel %vm1187_vm6, 16843009, %v2591_v1 }
  0x7d   : > { %2261 = vmatmul.msk.f32.gmra.mxu1 %vm691_vm0, %v671_v39  ;;  %v1194_v43 = vunpack.c.0.s8 %v2938_v38  ;;  %v1195_v9 = vunpack.c.1.s8 %v2938_v38 }
  0x82   : > { %2238 = vmatmul.msk.f32.gmra.mxu0 %vm691_vm0, %v664_v44 }
  0x83   : > { %2286 = vmatmul.msk.f32.gmra.mxu2 %vm691_vm0, %v680_v45 }
  0x84   : > { %2310 = vmatmul.msk.f32.gmra.mxu3 %vm691_vm0, %v688_v46 }
  0x85   : > { %2262 = vmatmul.msk.f32.gmra.mxu1 %vm691_vm0, %v672_v47 }
  0x8a   : > { %2239 = vmatmul.msk.f32.gmra.mxu0 %vm691_vm0, %v665_v52  ;;  %v1232_v52 = vunpack.c.0.s8 %v1224_v41 }
  0x8b   : > { %2287 = vmatmul.msk.f32.gmra.mxu2 %vm691_vm0, %v681_v53 }
  0x8c   : > { %2311 = vmatmul.msk.f32.gmra.mxu3 %vm691_vm0, %v689_v54  ;;  %v1205_v54 = vpack.c.b8 %v1204_v42, %v1204_v42  ;;  %vm2969_vm9 = vcmp.ne.s32.totalorder %v1232_v52, 0 }
  0x8d   : > { %2263 = vmatmul.msk.f32.gmra.mxu1 %vm691_vm0, %v673_v55  ;;  %v1206_v55 = vpack.c.b16 %v1194_v43, %v1194_v43 }
  0x8e   : > { %vm1217_vm10 = vnez %v1205_v54 }
  0x8f   : > { %v1207_v0 = vpack.c.b8 %v1206_v55, %v1206_v55  ;;  %v1225_v7 = vsel %vm1217_vm10, 16843009, %v2591_v1 }
  0x91   : > { %vm1218_vm11 = vnez %v1207_v0 }
  0x92   : > { %2240 = vmatmul.msk.f32.gmra.mxu0 %vm691_vm0, %v666_v60 }
  0x93   : > { %2288 = vmatmul.msk.f32.gmra.mxu2 %vm691_vm0, %v682_v61 }
  0x94   : > { %2312 = vmatmul.msk.f32.gmra.mxu3 %vm691_vm0, %v690_v62 }
  0x95   : > { %2264 = vmatmul.msk.f32.gmra.mxu1 %vm691_vm0, %v674_v63 }
  0xd7   : > { %v781_v15 = vpop.f32.mrf.mxu0 }
  0xd8   : > { %v1152_v17 = vmul.f32 %v1144_v12, %v781_v15  ;;  %v1196_v15 = vunpack.c.2.s8 %v2938_v38 }
  0xda   : > { %v894_v18 = vpop.f32.mrf.mxu1  ;;  %v1262_v20 = vsel %vm2911_vm3, -1e+10, %v1152_v17 }
  0xdb   : > { %v1160_v21 = vmul.f32 %v1144_v12, %v894_v18  ;;  %v2920_v22 = vsel %vm1296_vm4, -1e+10, %v1262_v20  ;;  %v1233_v18 = vunpack.c.0.s8 %v1225_v7  ;;  %v1226_v20 = vsel %vm1218_vm11, 16843009, %v2591_v1  ;;  %v1149_v7 = vld [vmem:[%s2906_s15 + $0x28] sm:$0xff] }
  0xdc   : > { %1329 = vmax.xlane.f32.xlu1 %v2920_v22 }
  0xdd   : > { %v1270_v29 = vsel %vm2911_vm3, -1e+10, %v1160_v21  ;;  %v1208_v21 = vpack.c.b16 %v1195_v9, %v1195_v9  ;;  %vm3004_vm12 = vcmp.ne.s32.totalorder %v1233_v18, 0  ;;  %v1150_v9 = vld [vmem:[%s2906_s15 + $0x30] sm:$0xff] }
  0xde   : > { %v1007_v24 = vpop.f32.mrf.mxu2  ;;  %v2935_v36 = vsel %vm1296_vm4, -1e+10, %v1270_v29 }
  0xdf   : > { %v1168_v27 = vmul.f32 %v1144_v12, %v1007_v24  ;;  %v1120_v28 = vpop.f32.mrf.mxu3  ;;  %v784_v30 = vpop.f32.mrf.mxu0  ;;  %v1210_v24 = vpack.c.b16 %v1196_v15, %v1196_v15  ;;  %v1209_v33 = vpack.c.b8 %v1208_v21, %v1208_v21 }
  0xe0   : > { %v1176_v39 = vmul.f32 %v1144_v12, %v1120_v28  ;;  %v1153_v60 = vmul.f32 %v1145_v32, %v784_v30  ;;  %v1148_v30 = vld [vmem:[%s2906_s15 + $0x20] sm:$0xff] }
  0xe1   : > { %v1278_v31 = vsel %vm2911_vm3, -1e+10, %v1168_v27  ;;  %v1211_v41 = vpack.c.b8 %v1210_v24, %v1210_v24  ;;  %vm1219_vm14 = vnez %v1209_v33 }
  0xe2   : > { %v2931_v35 = vsel %vm1296_vm4, -1e+10, %v1278_v31  ;;  %v897_v37 = vpop.f32.mrf.mxu1  ;;  %v1286_v48 = vsel %vm2911_vm3, -1e+10, %v1176_v39  ;;  %v1263_v5 = vsel %vm2944_vm8, -1e+10, %v1153_v60  ;;  %v1234_v31 = vunpack.c.0.s8 %v1226_v20 }
  0xe3   : > { %1361 = vmax.xlane.f32.xlu0 %v2931_v35  ;;  %v1161_v40 = vmul.f32 %v1145_v32, %v897_v37  ;;  %v2957_v56 = vsel %vm1296_vm4, -1e+10, %v1286_v48  ;;  %v2988_v12 = vsel %vm1296_vm4, -1e+10, %v1263_v5  ;;  %vm1220_vm15 = vnez %v1211_v41 }
  0xe4   : > { %1345 = vmax.xlane.f32.xlu1 %v2935_v36  ;;  %vm3025_vm13 = vcmp.ne.s32.totalorder %v1234_v31, 0  ;;  %v1197_v48 = vunpack.c.3.s8 %v2938_v38  ;;  %v1228_v60 = vsel %vm1220_vm15, 16843009, %v2591_v1 }
  0xe5   : > { %v1271_v49 = vsel %vm2944_vm8, -1e+10, %v1161_v40  ;;  %v1236_v5 = vunpack.c.0.s8 %v1228_v60 }
  0xe6   : > { %v1010_v44 = vpop.f32.mrf.mxu2  ;;  %v2965_v58 = vsel %vm1296_vm4, -1e+10, %v1271_v49  ;;  %v1212_v54 = vpack.c.b16 %v1197_v48, %v1197_v48 }
  0xe7   : > { %v1169_v46 = vmul.f32 %v1145_v32, %v1010_v44  ;;  %v1123_v47 = vpop.f32.mrf.mxu3  ;;  %v787_v50 = vpop.f32.mrf.mxu0  ;;  %vm3070_vm3 = vcmp.ne.s32.totalorder %v1236_v5, 0 }
  0xe8   : > { %v1177_v61 = vmul.f32 %v1145_v32, %v1123_v47  ;;  %v1154_v62 = vmul.f32 %v1146_v51, %v787_v50  ;;  %v1213_v0 = vpack.c.b8 %v1212_v54, %v1212_v54 }
  0xe9   : > { %v1279_v53 = vsel %vm2944_vm8, -1e+10, %v1169_v46 }
  0xea   : > { %v2961_v57 = vsel %vm1296_vm4, -1e+10, %v1279_v53  ;;  %v900_v59 = vpop.f32.mrf.mxu1  ;;  %v1287_v4 = vsel %vm2944_vm8, -1e+10, %v1177_v61  ;;  %v1264_v6 = vsel %vm2969_vm9, -1e+10, %v1154_v62  ;;  %vm1221_vm1 = vnez %v1213_v0 }
  0xeb   : > { %1377 = vmax.xlane.f32.xlu0 %v2957_v56  ;;  %1363 = vmax.xlane.f32.xlu2 %v2961_v57  ;;  %v2984_v10 = vsel %vm1296_vm4, -1e+10, %v1287_v4  ;;  %v2992_v13 = vsel %vm1296_vm4, -1e+10, %v1264_v6  ;;  %v1162_v16 = vmul.f32 %v1146_v51, %v900_v59  ;;  %v1227_v59 = vsel %vm1219_vm14, 16843009, %v2591_v1 }
  0xec   : > { %1347 = vmax.xlane.f32.xlu1 %v2965_v58  ;;  %v1235_v4 = vunpack.c.0.s8 %v1227_v59 }
  0xed   : > { %v1272_v26 = vsel %vm2969_vm9, -1e+10, %v1162_v16 }
  0xee   : > { %v1013_v2 = vpop.f32.mrf.mxu2  ;;  %v3011_v34 = vsel %vm1296_vm4, -1e+10, %v1272_v26  ;;  %vm3066_vm2 = vcmp.ne.s32.totalorder %v1235_v4, 0 }
  0xef   : > { %v1126_v3 = vpop.f32.mrf.mxu3  ;;  %v790_v8 = vpop.f32.mrf.mxu0  ;;  %v1170_v43 = vmul.f32 %v1146_v51, %v1013_v2 }
  0xf0   : > { %v1178_v17 = vmul.f32 %v1146_v51, %v1126_v3  ;;  %v1155_v55 = vmul.f32 %v1147_v19, %v790_v8 }
  0xf1   : > { %v1280_v49 = vsel %vm2969_vm9, -1e+10, %v1170_v43 }
  0xf2   : > { %v903_v14 = vpop.f32.mrf.mxu1  ;;  %v1288_v27 = vsel %vm2969_vm9, -1e+10, %v1178_v17  ;;  %v3041_v38 = vsel %vm1296_vm4, -1e+10, %v1280_v49  ;;  %v1265_v6 = vsel %vm3004_vm12, -1e+10, %v1155_v55 }
  0xf3   : > { %1379 = vmax.xlane.f32.xlu2 %v2984_v10  ;;  %1331 = vmax.xlane.f32.xlu0 %v2988_v12  ;;  %v3015_v37 = vsel %vm1296_vm4, -1e+10, %v1288_v27  ;;  %v1163_v42 = vmul.f32 %v1147_v19, %v903_v14  ;;  %v1229_v27 = vsel %vm1221_vm1, 16843009, %v2591_v1 }
  0xf4   : > { %1333 = vmax.xlane.f32.xlu1 %v2992_v13 }
  0xf5   : > { %v1273_v50 = vsel %vm3004_vm12, -1e+10, %v1163_v42 }
  0xf6   : > { %v1016_v23 = vpop.f32.mrf.mxu2  ;;  %v3045_v61 = vsel %vm1296_vm4, -1e+10, %v1273_v50 }
  0xf7   : > { %v1129_v25 = vpop.f32.mrf.mxu3  ;;  %v793_v32 = vpop.f32.mrf.mxu0  ;;  %v1171_v2 = vmul.f32 %v1147_v19, %v1016_v23 }
  0xf8   : > { %v1179_v29 = vmul.f32 %v1147_v19, %v1129_v25  ;;  %v1156_v18 = vmul.f32 %v1148_v30, %v793_v32  ;;  %v3064_v19 = vsel %vm1296_vm4, -1e+10, %v1265_v6 }
  0xf9   : > { %v1281_v14 = vsel %vm3004_vm12, -1e+10, %v1171_v2 }
  0xfa   : > { %v1289_v39 = vsel %vm3004_vm12, -1e+10, %v1179_v29  ;;  %v906_v40 = vpop.f32.mrf.mxu1  ;;  %v3079_v28 = vsel %vm1296_vm4, -1e+10, %v1281_v14  ;;  %v1266_v42 = vsel %vm3025_vm13, -1e+10, %v1156_v18 }
  0xfb   : > { %1349 = vmax.xlane.f32.xlu2 %v3011_v34  ;;  %1381 = vmax.xlane.f32.xlu0 %v3015_v37  ;;  %v3023_v44 = vsel %vm1296_vm4, -1e+10, %v1289_v39  ;;  %v1164_v45 = vmul.f32 %v1148_v30, %v906_v40  ;;  %v1237_v40 = vunpack.c.0.s8 %v1229_v27  ;;  %v3117_v46 = vsel %vm1296_vm4, -1e+10, %v1266_v42 }
  0xfc   : > { %1383 = vmax.xlane.f32.xlu1 %v3023_v44 }
  0xfd   : > { %v1274_v51 = vsel %vm3025_vm13, -1e+10, %v1164_v45  ;;  %vm3119_vm5 = vcmp.ne.s32.totalorder %v1237_v40, 0 }
  0xfe   : > { %v1019_v47 = vpop.f32.mrf.mxu2  ;;  %v3049_v62 = vsel %vm1296_vm4, -1e+10, %v1274_v51 }
  0xff   : > { %v1132_v52 = vpop.f32.mrf.mxu3  ;;  %v796_v53 = vpop.f32.mrf.mxu0  ;;  %v1172_v3 = vmul.f32 %v1148_v30, %v1019_v47  ;;  %v1151_v47 = vld [vmem:[%s2906_s15 + $0x38] sm:$0xff]  ;;  %s1980_s15 = sshll.u32 %s1977_s13, 4  ;;  %s1981_s15 = int_to_ptr.hbm [resolvable:$true] %s1980_s15 }
 0x100   : > { %v1180_v24 = vmul.f32 %v1148_v30, %v1132_v52  ;;  %v1157_v30 = vmul.f32 %v1149_v7, %v796_v53  ;;  %s2525_s24 = sshra.s32 %s1981_s15, 4  ;;  %s2526_s24 = int_to_ptr.hbm [resolvable:$true] %s2525_s24 }
 0x101   : > { %v1282_v15 = vsel %vm3025_vm13, -1e+10, %v1172_v3  ;;  %s2527_s18 = scalar_lea.hbm %s2526_s24, 256  ;;  %p2532_p1 = scmp.lt.s32.totalorder %s2526_s24, %s3576_s6 }
 0x102   : > { %v909_v63 = vpop.f32.mrf.mxu1  ;;  %v3083_v29 = vsel %vm1296_vm4, -1e+10, %v1282_v15  ;;  %v1290_v41 = vsel %vm3025_vm13, -1e+10, %v1180_v24  ;;  %v1267_v49 = vsel %vm3066_vm2, -1e+10, %v1157_v30  ;;  %p2528_p12 = scmp.ne.s32.totalorder %s2526_s24, %s2527_s18  ;;  %p2533_p2 = scmp.lt.s32.totalorder %s2531_s28, %s2527_s18 }
 0x103   : > { %1365 = vmax.xlane.f32.xlu2 %v3041_v38  ;;  %1351 = vmax.xlane.f32.xlu0 %v3045_v61  ;;  %v3113_v52 = vsel %vm1296_vm4, -1e+10, %v1290_v41  ;;  %v1165_v59 = vmul.f32 %v1149_v7, %v909_v63  ;;  %v3127_v3 = vsel %vm1296_vm4, -1e+10, %v1267_v49 }
 0x104   : > { %1353 = vmax.xlane.f32.xlu1 %v3049_v62  ;;  %p2529_p13 = pnand %p2528_p12, %p2669_p4  ;;  %p2534_p3 = por %p2533_p2, %p2532_p1 }
 0x105   : > { %v1275_v14 = vsel %vm3066_vm2, -1e+10, %v1165_v59 }
 0x106   : > { %v1022_v8 = vpop.f32.mrf.mxu2  ;;  %v3160_v24 = vsel %vm1296_vm4, -1e+10, %v1275_v14  ;;  %p2530_p0 = pneg %p2529_p13 }
 0x107   : > { %v1173_v16 = vmul.f32 %v1149_v7, %v1022_v8  ;;  %v1135_v17 = vpop.f32.mrf.mxu3  ;;  %v799_v21 = vpop.f32.mrf.mxu0 }
 0x108   : > { %v1158_v25 = vmul.f32 %v1150_v9, %v799_v21  ;;  %v1181_v60 = vmul.f32 %v1149_v7, %v1135_v17  ;;  %p2535_p5 = pnand %p2534_p3, %p2530_p0 }
 0x109   : > { %v1283_v26 = vsel %vm3066_vm2, -1e+10, %v1173_v16 }
 0x10a   : > { %v912_v31 = vpop.f32.mrf.mxu1  ;;  %v3087_v32 = vsel %vm1296_vm4, -1e+10, %v1283_v26  ;;  %v1268_v1 = vsel %vm3070_vm3, -1e+10, %v1158_v25  ;;  %v1291_v15 = vsel %vm3066_vm2, -1e+10, %v1181_v60 }
 0x10b   : > { %1367 = vmax.xlane.f32.xlu0 %v3079_v28  ;;  %1335 = vmax.xlane.f32.xlu2 %v3064_v19  ;;  %v1166_v33 = vmul.f32 %v1150_v9, %v912_v31  ;;  %v3095_v39 = vsel %vm1296_vm4, -1e+10, %v1268_v1  ;;  %v3164_v25 = vsel %vm1296_vm4, -1e+10, %v1291_v15 }
 0x10c   : > { %1369 = vmax.xlane.f32.xlu1 %v3083_v29 }
 0x10d   : > { %v1276_v43 = vsel %vm3070_vm3, -1e+10, %v1166_v33 }
 0x10e   : > { %v1025_v45 = vpop.f32.mrf.mxu2  ;;  %v3107_v48 = vsel %vm1296_vm4, -1e+10, %v1276_v43 }
 0x10f   : > { %v1174_v50 = vmul.f32 %v1150_v9, %v1025_v45  ;;  %v1138_v51 = vpop.f32.mrf.mxu3  ;;  %v802_v54 = vpop.f32.mrf.mxu0 }
 0x110   : > { %v1182_v53 = vmul.f32 %v1150_v9, %v1138_v51  ;;  %v1159_v2 = vmul.f32 %v1151_v47, %v802_v54 }
 0x111   : > { %v1284_v0 = vsel %vm3070_vm3, -1e+10, %v1174_v50 }
 0x112   : > { %v3131_v4 = vsel %vm1296_vm4, -1e+10, %v1284_v0  ;;  %v1292_v5 = vsel %vm3070_vm3, -1e+10, %v1182_v53  ;;  %v915_v6 = vpop.f32.mrf.mxu1  ;;  %v1269_v8 = vsel %vm3119_vm5, -1e+10, %v1159_v2 }
 0x113   : > { %1385 = vmax.xlane.f32.xlu2 %v3113_v52  ;;  %1337 = vmax.xlane.f32.xlu0 %v3117_v46  ;;  %v3139_v63 = vsel %vm1296_vm4, -1e+10, %v1292_v5  ;;  %v1167_v7 = vmul.f32 %v1151_v47, %v915_v6  ;;  %v3145_v9 = vsel %vm1296_vm4, -1e+10, %v1269_v8 }
 0x114   : > { %1339 = vmax.xlane.f32.xlu1 %v3127_v3 }
 0x115   : > { %v1277_v16 = vsel %vm3119_vm5, -1e+10, %v1167_v7 }
 0x116   : > { %v3156_v17 = vsel %vm1296_vm4, -1e+10, %v1277_v16  ;;  %v1028_v18 = vpop.f32.mrf.mxu2 }
 0x117   : > { %v1175_v21 = vmul.f32 %v1151_v47, %v1028_v18  ;;  %v1141_v23 = vpop.f32.mrf.mxu3 }
 0x118   : > { %v1183_v20 = vmul.f32 %v1151_v47, %v1141_v23 }
 0x119   : > { %v1285_v26 = vsel %vm3119_vm5, -1e+10, %v1175_v21 }
 0x11a   : > { %v3170_v27 = vsel %vm1296_vm4, -1e+10, %v1285_v26  ;;  %v1293_v31 = vsel %vm3119_vm5, -1e+10, %v1183_v20 }
 0x11b   : > { %1355 = vmax.xlane.f32.xlu2 %v3160_v24  ;;  %1387 = vmax.xlane.f32.xlu0 %v3164_v25  ;;  %v3178_v30 = vsel %vm1296_vm4, -1e+10, %v1293_v31 }
 0x11c   : > { %1341 = vmax.xlane.f32.xlu1 %v3095_v39 }
 0x123   : > { %1371 = vmax.xlane.f32.xlu2 %v3087_v32  ;;  %1373 = vmax.xlane.f32.xlu0 %v3131_v4 }
 0x124   : > { %1389 = vmax.xlane.f32.xlu1 %v3139_v63 }
 0x12b   : > { %1357 = vmax.xlane.f32.xlu2 %v3107_v48  ;;  %1343 = vmax.xlane.f32.xlu0 %v3145_v9 }
 0x12c   : > { %1359 = vmax.xlane.f32.xlu1 %v3156_v17 }
 0x133   : > { %1375 = vmax.xlane.f32.xlu0 %v3170_v27 }
 0x134   : > { %1391 = vmax.xlane.f32.xlu1 %v3178_v30 }
 0x14f   : > { %v1330_v11 = vpop.xlane.xlu1 %1329 }
 0x150   : > { %v1393_v1 = vsub.f32 %v2920_v22, %v1330_v11 }
 0x152   : > { %v1425_v33 = vmul.f32 1.442695, %v1393_v1 }
 0x154   : > { %2383 = vpow2.f32 %v1425_v33 }
 0x156   : > { %v1362_v40 = vpop.xlane.xlu0 %1361 }
 0x157   : > { %v1409_v41 = vsub.f32 %v2931_v35, %v1362_v40  ;;  %v1346_v42 = vpop.xlane.xlu1 %1345 }
 0x158   : > { %v1401_v45 = vsub.f32 %v2935_v36, %v1346_v42 }
 0x159   : > { %v1457_v43 = vmul.f32 1.442695, %v1409_v41 }
 0x15a   : > { %v3192_v47 = vpop.eup %2383  ;;  %v1441_v49 = vmul.f32 1.442695, %v1401_v45 }
 0x15b   : > { %2385 = vpow2.f32 %v1457_v43  ;;  %1489 = vadd.xlane.f32.xlu2 %v3192_v47 }
 0x15c   : > { %2387 = vpow2.f32 %v1441_v49 }
 0x15e   : > { %v1378_v50 = vpop.xlane.xlu0 %1377  ;;  %v1364_v51 = vpop.xlane.xlu2 %1363 }
 0x15f   : > { %v1417_v22 = vsub.f32 %v2957_v56, %v1378_v50  ;;  %v1410_v53 = vsub.f32 %v2961_v57, %v1364_v51  ;;  %v1348_v54 = vpop.xlane.xlu1 %1347 }
 0x160   : > { %v1402_v36 = vsub.f32 %v2965_v58, %v1348_v54 }
 0x161   : > { %v1473_v55 = vmul.f32 1.442695, %v1417_v22  ;;  %v1459_v35 = vmul.f32 1.442695, %v1410_v53  ;;  %v3197_v59 = vpop.eup %2385 }
 0x162   : > { %v3199_v60 = vpop.eup %2387  ;;  %v1443_v5 = vmul.f32 1.442695, %v1402_v36 }
 0x163   : > { %2389 = vpow2.f32 %v1459_v35  ;;  %1521 = vadd.xlane.f32.xlu2 %v3197_v59  ;;  %1505 = vadd.xlane.f32.xlu0 %v3199_v60 }
 0x164   : > { %2391 = vpow2.f32 %v1473_v55 }
 0x166   : > { %v1380_v0 = vpop.xlane.xlu2 %1379  ;;  %v1332_v2 = vpop.xlane.xlu0 %1331 }
 0x167   : > { %v1394_v56 = vsub.f32 %v2988_v12, %v1332_v2  ;;  %v1334_v57 = vpop.xlane.xlu1 %1333  ;;  %v1418_v14 = vsub.f32 %v2984_v10, %v1380_v0 }
 0x168   : > { %v1395_v58 = vsub.f32 %v2992_v13, %v1334_v57 }
 0x169   : > { %v1427_v6 = vmul.f32 1.442695, %v1394_v56  ;;  %v3205_v7 = vpop.eup %2389  ;;  %v1475_v18 = vmul.f32 1.442695, %v1418_v14 }
 0x16a   : > { %v3207_v8 = vpop.eup %2391  ;;  %1523 = vadd.xlane.f32.xlu1 %v3205_v7  ;;  %v1429_v23 = vmul.f32 1.442695, %v1395_v58 }
 0x16b   : > { %2393 = vpow2.f32 %v1427_v6  ;;  %1537 = vadd.xlane.f32.xlu0 %v3207_v8 }
 0x16c   : > { %2395 = vpow2.f32 %v1443_v5 }
 0x16e   : > { %v1350_v15 = vpop.xlane.xlu2 %1349  ;;  %v1382_v16 = vpop.xlane.xlu0 %1381 }
 0x16f   : > { %v1403_v12 = vsub.f32 %v3011_v34, %v1350_v15  ;;  %v1384_v21 = vpop.xlane.xlu1 %1383  ;;  %v1419_v10 = vsub.f32 %v3015_v37, %v1382_v16 }
 0x170   : > { %v1420_v13 = vsub.f32 %v3023_v44, %v1384_v21 }
 0x171   : > { %v1445_v20 = vmul.f32 1.442695, %v1403_v12  ;;  %v3214_v26 = vpop.eup %2393  ;;  %v1477_v33 = vmul.f32 1.442695, %v1419_v10 }
 0x172   : > { %v3216_v31 = vpop.eup %2395  ;;  %1491 = vadd.xlane.f32.xlu2 %v3214_v26  ;;  %v1479_v42 = vmul.f32 1.442695, %v1420_v13 }
 0x173   : > { %2397 = vpow2.f32 %v1445_v20  ;;  %1507 = vadd.xlane.f32.xlu0 %v3216_v31 }
 0x174   : > { %2399 = vpow2.f32 %v1475_v18 }
 0x175   : > { %2401 = vpow2.f32 %v1429_v23 }
 0x176   : > { %v1366_v34 = vpop.xlane.xlu2 %1365  ;;  %v1352_v11 = vpop.xlane.xlu0 %1351 }
 0x177   : > { %v1411_v1 = vsub.f32 %v3041_v38, %v1366_v34  ;;  %v1354_v40 = vpop.xlane.xlu1 %1353  ;;  %v1404_v49 = vsub.f32 %v3045_v61, %v1352_v11 }
 0x178   : > { %v1405_v44 = vsub.f32 %v3049_v62, %v1354_v40 }
 0x179   : > { %v3223_v41 = vpop.eup %2397  ;;  %v1461_v43 = vmul.f32 1.442695, %v1411_v1  ;;  %v1447_v51 = vmul.f32 1.442695, %v1404_v49 }
 0x17a   : > { %v3225_v45 = vpop.eup %2399  ;;  %1509 = vadd.xlane.f32.xlu1 %v3223_v41  ;;  %v1449_v55 = vmul.f32 1.442695, %v1405_v44 }
 0x17b   : > { %v3228_v37 = vpop.eup %2401  ;;  %2403 = vpow2.f32 %v1461_v43  ;;  %1539 = vadd.xlane.f32.xlu2 %v3225_v45 }
 0x17c   : > { %2405 = vpow2.f32 %v1477_v33  ;;  %1493 = vadd.xlane.f32.xlu0 %v3228_v37 }
 0x17d   : > { %2407 = vpow2.f32 %v1479_v42 }
 0x17e   : > { %v1368_v38 = vpop.xlane.xlu0 %1367  ;;  %v1336_v50 = vpop.xlane.xlu2 %1335  ;;  %2409 = vpow2.f32 %v1447_v51  ;;  %v658_v51 = vld [vmem:[%s3275_s19 + $0x1f8] sm:$0xff] }
 0x17f   : > { %v1396_v22 = vsub.f32 %v3064_v19, %v1336_v50  ;;  %v1370_v53 = vpop.xlane.xlu1 %1369  ;;  %v1412_v62 = vsub.f32 %v3079_v28, %v1368_v38  ;;  %v642_v50 = vld [vmem:[%s3275_s19 + $0x178] sm:$0xff]  ;;  %1836 = vmatpush.msrb.mxu3 %v658_v51 }
 0x180   : > { %v1413_v19 = vsub.f32 %v3083_v29, %v1370_v53  ;;  %1795 = vmatpush.msrb.mxu2 %v642_v50  ;;  %v641_v53 = vld [vmem:[%s3275_s19 + $0x170] sm:$0xff]  ;;  %v603_v50 = vld [vmem:[%s3275_s19 + $0x40] sm:$0xff] }
 0x181   : > { %v3235_v54 = vpop.eup %2403  ;;  %v1431_v35 = vmul.f32 1.442695, %v1396_v22  ;;  %v1463_v57 = vmul.f32 1.442695, %v1412_v62  ;;  %v610_v22 = vld [vmem:[%s3275_s19 + $0x78] sm:$0xff] }
 0x182   : > { %v3237_v36 = vpop.eup %2405  ;;  %1525 = vadd.xlane.f32.xlu1 %v3235_v54  ;;  %v1465_v14 = vmul.f32 1.442695, %v1413_v19  ;;  %1713 = vmatpush.msrb.mxu0 %v610_v22  ;;  %v608_v19 = vld [vmem:[%s3275_s19 + $0x68] sm:$0xff] }
 0x183   : > { %v3240_v61 = vpop.eup %2407  ;;  %1541 = vadd.xlane.f32.xlu2 %v3237_v36  ;;  %2411 = vpow2.f32 %v1431_v35  ;;  %v626_v35 = vld [vmem:[%s3275_s19 + $0xf8] sm:$0xff]  ;;  %1796 = vmatpush.msrb.mxu2 %v641_v53 }
 0x184   : > { %1543 = vadd.xlane.f32.xlu0 %v3240_v61  ;;  %2413 = vpow2.f32 %v1449_v55  ;;  %v3247_v6 = vpop.eup %2409  ;;  %v657_v55 = vld [vmem:[%s3275_s19 + $0x1f0] sm:$0xff]  ;;  %1754 = vmatpush.msrb.mxu1 %v626_v35  ;;  %v602_v53 = vld [vmem:[%s3275_s19 + $0x38] sm:$0xff] }
 0x185   : > { %1837 = vmatpush.msrb.mxu3 %v657_v55  ;;  %v622_v55 = vld [vmem:[%s3275_s19 + $0xd8] sm:$0xff] }
 0x186   : > { %v1386_v0 = vpop.xlane.xlu2 %1385  ;;  %v1338_v2 = vpop.xlane.xlu0 %1337 }
 0x187   : > { %v1421_v56 = vsub.f32 %v3113_v52, %v1386_v0  ;;  %v1340_v5 = vpop.xlane.xlu1 %1339  ;;  %v1397_v28 = vsub.f32 %v3117_v46, %v1338_v2  ;;  %v656_v0 = vld [vmem:[%s3275_s19 + $0x1e8] sm:$0xff] }
 0x188   : > { %v1398_v29 = vsub.f32 %v3127_v3, %v1340_v5  ;;  %1838 = vmatpush.msrb.mxu3 %v656_v0  ;;  %v600_v0 = vld [vmem:[%s3275_s19 + $0x28] sm:$0xff] }
 0x189   : > { %v1481_v58 = vmul.f32 1.442695, %v1421_v56  ;;  %v3249_v15 = vpop.eup %2411  ;;  %v1433_v21 = vmul.f32 1.442695, %v1397_v28  ;;  %v625_v56 = vld [vmem:[%s3275_s19 + $0xf0] sm:$0xff] }
 0x18a   : > { %v3251_v16 = vpop.eup %2413  ;;  %1495 = vadd.xlane.f32.xlu1 %v3249_v15  ;;  %v1435_v10 = vmul.f32 1.442695, %v1398_v29  ;;  %1755 = vmatpush.msrb.mxu1 %v625_v56  ;;  %v636_v56 = vld [vmem:[%s3275_s19 + $0x148] sm:$0xff] }
 0x18b   : > { %2415 = vpow2.f32 %v1481_v58  ;;  %1511 = vadd.xlane.f32.xlu2 %v3247_v6  ;;  %v624_v58 = vld [vmem:[%s3275_s19 + $0xe8] sm:$0xff] }
 0x18c   : > { %2417 = vpow2.f32 %v1463_v57  ;;  %1513 = vadd.xlane.f32.xlu0 %v3251_v16  ;;  %v639_v57 = vld [vmem:[%s3275_s19 + $0x160] sm:$0xff]  ;;  %1756 = vmatpush.msrb.mxu1 %v624_v58  ;;  %v598_v58 = vld [vmem:[%s3275_s19 + $0x18] sm:$0xff] }
 0x18d   : > { %2419 = vpow2.f32 %v1465_v14 }
 0x18e   : > { %v1356_v52 = vpop.xlane.xlu2 %1355  ;;  %v1388_v12 = vpop.xlane.xlu0 %1387 }
 0x18f   : > { %v1406_v18 = vsub.f32 %v3160_v24, %v1356_v52  ;;  %v1342_v23 = vpop.xlane.xlu1 %1341  ;;  %v1422_v46 = vsub.f32 %v3164_v25, %v1388_v12  ;;  %v607_v52 = vld [vmem:[%s3275_s19 + $0x60] sm:$0xff] }
 0x190   : > { %v1399_v44 = vsub.f32 %v3095_v39, %v1342_v23  ;;  %v609_v39 = vld [vmem:[%s3275_s19 + $0x70] sm:$0xff] }
 0x191   : > { %v3259_v20 = vpop.eup %2415  ;;  %v1451_v13 = vmul.f32 1.442695, %v1406_v18  ;;  %v1483_v33 = vmul.f32 1.442695, %v1422_v46  ;;  %1714 = vmatpush.msrb.mxu0 %v609_v39  ;;  %v655_v18 = vld [vmem:[%s3275_s19 + $0x1e0] sm:$0xff] }
 0x192   : > { %v3261_v34 = vpop.eup %2417  ;;  %1545 = vadd.xlane.f32.xlu1 %v3259_v20  ;;  %v1437_v2 = vmul.f32 1.442695, %v1399_v44  ;;  %1839 = vmatpush.msrb.mxu3 %v655_v18  ;;  %v634_v18 = vld [vmem:[%s3275_s19 + $0x138] sm:$0xff] }
 0x193   : > { %v3263_v11 = vpop.eup %2419  ;;  %2421 = vpow2.f32 %v1451_v13  ;;  %1527 = vadd.xlane.f32.xlu2 %v3261_v34  ;;  %1715 = vmatpush.msrb.mxu0 %v608_v19  ;;  %v638_v13 = vld [vmem:[%s3275_s19 + $0x158] sm:$0xff]  ;;  %v601_v19 = vld [vmem:[%s3275_s19 + $0x30] sm:$0xff] }
 0x194   : > { %2423 = vpow2.f32 %v1433_v21  ;;  %1529 = vadd.xlane.f32.xlu0 %v3263_v11  ;;  %v623_v21 = vld [vmem:[%s3275_s19 + $0xe0] sm:$0xff] }
 0x195   : > { %2425 = vpow2.f32 %v1435_v10  ;;  %v606_v10 = vld [vmem:[%s3275_s19 + $0x58] sm:$0xff]  ;;  %1716 = vmatpush.msrb.mxu0 %v607_v52  ;;  %1757 = vmatpush.msrb.mxu1 %v623_v21 }
 0x196   : > { %v1372_v3 = vpop.xlane.xlu2 %1371  ;;  %v1374_v24 = vpop.xlane.xlu0 %1373 }
 0x197   : > { %v1414_v1 = vsub.f32 %v3087_v32, %v1372_v3  ;;  %v1390_v40 = vpop.xlane.xlu1 %1389  ;;  %v654_v3 = vld [vmem:[%s3275_s19 + $0x1d8] sm:$0xff]  ;;  %1717 = vmatpush.msrb.mxu0 %v606_v10  ;;  %1758 = vmatpush.msrb.mxu1 %v622_v55  ;;  %v653_v10 = vld [vmem:[%s3275_s19 + $0x1d0] sm:$0xff]  ;;  %v648_v55 = vld [vmem:[%s3275_s19 + $0x1a8] sm:$0xff] }
 0x198   : > { %v1423_v43 = vsub.f32 %v3139_v63, %v1390_v40  ;;  %v1415_v63 = vsub.f32 %v3131_v4, %v1374_v24  ;;  %v640_v4 = vld [vmem:[%s3275_s19 + $0x168] sm:$0xff]  ;;  %v605_v24 = vld [vmem:[%s3275_s19 + $0x50] sm:$0xff]  ;;  %1840 = vmatpush.msrb.mxu3 %v654_v3 }
 0x199   : > { %v3277_v42 = vpop.eup %2421  ;;  %v1467_v25 = vmul.f32 1.442695, %v1414_v1  ;;  %1797 = vmatpush.msrb.mxu2 %v640_v4  ;;  %v604_v40 = vld [vmem:[%s3275_s19 + $0x48] sm:$0xff]  ;;  %1718 = vmatpush.msrb.mxu0 %v605_v24  ;;  %v633_v24 = vld [vmem:[%s3275_s19 + $0x130] sm:$0xff] }
 0x19a   : > { %v3280_v49 = vpop.eup %2423  ;;  %v1485_v38 = vmul.f32 1.442695, %v1423_v43  ;;  %1515 = vadd.xlane.f32.xlu1 %v3277_v42  ;;  %v1469_v5 = vmul.f32 1.442695, %v1415_v63  ;;  %1841 = vmatpush.msrb.mxu3 %v653_v10  ;;  %v652_v3 = vld [vmem:[%s3275_s19 + $0x1c8] sm:$0xff] }
 0x19b   : > { %v3282_v32 = vpop.eup %2425  ;;  %2427 = vpow2.f32 %v1467_v25  ;;  %1497 = vadd.xlane.f32.xlu2 %v3280_v49  ;;  %1798 = vmatpush.msrb.mxu2 %v639_v57  ;;  %v599_v57 = vld [vmem:[%s3275_s19 + $0x20] sm:$0xff] }
 0x19c   : > { %2429 = vpow2.f32 %v1483_v33  ;;  %1499 = vadd.xlane.f32.xlu0 %v3282_v32  ;;  %1719 = vmatpush.msrb.mxu0 %v604_v40  ;;  %v632_v40 = vld [vmem:[%s3275_s19 + $0x128] sm:$0xff] }
 0x19d   : > { %2431 = vpow2.f32 %v1485_v38  ;;  %1799 = vmatpush.msrb.mxu2 %v638_v13  ;;  %v597_v13 = vld [vmem:[%s3275_s19 + $0x10] sm:$0xff]  ;;  %1842 = vmatpush.msrb.mxu3 %v652_v3 }
 0x19e   : > { %v3296_v62 = vpop.xlane.xlu0 %1343  ;;  %v1358_v29 = vpop.xlane.xlu2 %1357  ;;  %2433 = vpow2.f32 %v1437_v2  ;;  %1720 = vmatpush.msrb.mxu0 %v603_v50  ;;  %v620_v2 = vld [vmem:[%s3275_s19 + $0xc8] sm:$0xff]  ;;  %v650_v50 = vld [vmem:[%s3275_s19 + $0x1b8] sm:$0xff] }
 0x19f   : > { %v1360_v14 = vpop.xlane.xlu1 %1359  ;;  %2435 = vpow2.f32 %v1469_v5  ;;  %v1407_v46 = vsub.f32 %v3107_v48, %v1358_v29  ;;  %v619_v5 = vld [vmem:[%s3275_s19 + $0xc0] sm:$0xff]  ;;  %v618_v29 = vld [vmem:[%s3275_s19 + $0xb8] sm:$0xff] }
 0x1a0   : > { %v1408_v22 = vsub.f32 %v3156_v17, %v1360_v14  ;;  %1721 = vmatpush.msrb.mxu0 %v602_v53  ;;  %v635_v14 = vld [vmem:[%s3275_s19 + $0x140] sm:$0xff]  ;;  %v612_v53 = vld [vmem:[%s3275_s19 + $0x88] sm:$0xff] }
 0x1a1   : > { %v3304_v28 = vpop.eup %2427  ;;  %v1453_v25 = vmul.f32 1.442695, %v1407_v46  ;;  %v617_v46 = vld [vmem:[%s3275_s19 + $0xb0] sm:$0xff] }
 0x1a2   : > { %v3307_v12 = vpop.eup %2429  ;;  %1531 = vadd.xlane.f32.xlu1 %v3304_v28  ;;  %v1455_v63 = vmul.f32 1.442695, %v1408_v22  ;;  %1722 = vmatpush.msrb.mxu0 %v601_v19  ;;  %v614_v22 = vld [vmem:[%s3275_s19 + $0x98] sm:$0xff]  ;;  %v628_v19 = vld [vmem:[%s3275_s19 + $0x108] sm:$0xff] }
 0x1a3   : > { %v3311_v23 = vpop.eup %2431  ;;  %1547 = vadd.xlane.f32.xlu2 %v3307_v12 }
 0x1a4   : > { %1549 = vadd.xlane.f32.xlu0 %v3311_v23  ;;  %v3323_v44 = vpop.eup %2433  ;;  %1723 = vmatpush.msrb.mxu0 %v600_v0  ;;  %v627_v0 = vld [vmem:[%s3275_s19 + $0x100] sm:$0xff] }
 0x1a5   : > { %v3327_v51 = vpop.eup %2435 }
 0x1a6   : > { %v1376_v1 = vpop.xlane.xlu0 %1375  ;;  %1724 = vmatpush.msrb.mxu0 %v599_v57  ;;  %v644_v57 = vld [vmem:[%s3275_s19 + $0x188] sm:$0xff] }
 0x1a7   : > { %v1416_v33 = vsub.f32 %v3170_v27, %v1376_v1  ;;  %v1392_v43 = vpop.xlane.xlu1 %1391  ;;  %v596_v1 = vld [vmem:[%s3275_s19 + $0x8] sm:$0xff] }
 0x1a8   : > { %v1424_v38 = vsub.f32 %v3178_v30, %v1392_v43  ;;  %v1400_v30 = vsub.f32 %v3145_v9, %v3296_v62  ;;  %v621_v9 = vld [vmem:[%s3275_s19 + $0xd0] sm:$0xff]  ;;  %1725 = vmatpush.msrb.mxu0 %v598_v58  ;;  %v595_v43 = vld [vmem:[%s3275_s19] sm:$0xff] }
 0x1a9   : > { %v1471_v48 = vmul.f32 1.442695, %v1416_v33  ;;  %v637_v62 = vld [vmem:[%s3275_s19 + $0x150] sm:$0xff]  ;;  %1759 = vmatpush.msrb.mxu1 %v621_v9  ;;  %v616_v33 = vld [vmem:[%s3275_s19 + $0xa8] sm:$0xff]  ;;  %v611_v9 = vld [vmem:[%s3275_s19 + $0x80] sm:$0xff] }
 0x1aa   : > { %v1487_v27 = vmul.f32 1.442695, %v1424_v38  ;;  %1501 = vadd.xlane.f32.xlu1 %v3323_v44  ;;  %v1439_v39 = vmul.f32 1.442695, %v1400_v30  ;;  %1800 = vmatpush.msrb.mxu2 %v637_v62  ;;  %v631_v38 = vld [vmem:[%s3275_s19 + $0x120] sm:$0xff]  ;;  %v613_v30 = vld [vmem:[%s3275_s19 + $0x90] sm:$0xff] }
 0x1ab   : > { %2437 = vpow2.f32 %v1471_v48  ;;  %1533 = vadd.xlane.f32.xlu2 %v3327_v51  ;;  %1760 = vmatpush.msrb.mxu1 %v620_v2  ;;  %v615_v48 = vld [vmem:[%s3275_s19 + $0xa0] sm:$0xff]  ;;  %v646_v2 = vld [vmem:[%s3275_s19 + $0x198] sm:$0xff] }
 0x1ac   : > { %2439 = vpow2.f32 %v1453_v25  ;;  %1801 = vmatpush.msrb.mxu2 %v636_v56  ;;  %1726 = vmatpush.msrb.mxu0 %v597_v13  ;;  %v651_v25 = vld [vmem:[%s3275_s19 + $0x1c0] sm:$0xff]  ;;  %v645_v56 = vld [vmem:[%s3275_s19 + $0x190] sm:$0xff] }
 0x1ad   : > { %2441 = vpow2.f32 %v1487_v27  ;;  %1761 = vmatpush.msrb.mxu1 %v619_v5  ;;  %1843 = vmatpush.msrb.mxu3 %v651_v25  ;;  %v630_v27 = vld [vmem:[%s3275_s19 + $0x118] sm:$0xff]  ;;  %v647_v62 = vld [vmem:[%s3275_s19 + $0x1a0] sm:$0xff] }
 0x1ae   : > { %2443 = vpow2.f32 %v1455_v63  ;;  %1802 = vmatpush.msrb.mxu2 %v635_v14  ;;  %1727 = vmatpush.msrb.mxu0 %v596_v1  ;;  %v649_v63 = vld [vmem:[%s3275_s19 + $0x1b0] sm:$0xff]  ;;  %v643_v5 = vld [vmem:[%s3275_s19 + $0x180] sm:$0xff] }
 0x1af   : > { %2445 = vpow2.f32 %v1439_v39  ;;  %1762 = vmatpush.msrb.mxu1 %v618_v29  ;;  %1844 = vmatpush.msrb.mxu3 %v650_v50  ;;  %v629_v39 = vld [vmem:[%s3275_s19 + $0x110] sm:$0xff] }
 0x1b0   : > { %1803 = vmatpush.msrb.mxu2 %v634_v18  ;;  %1728 = vmatpush.msrb.mxu0 %v595_v43 }
 0x1b1   : > { %v3336_v17 = vpop.eup %2437  ;;  %1763 = vmatpush.msrb.mxu1 %v617_v46  ;;  %1845 = vmatpush.msrb.mxu3 %v649_v63 }
 0x1b2   : > { %v3338_v35 = vpop.eup %2439  ;;  %1535 = vadd.xlane.f32.xlu0 %v3336_v17  ;;  %1804 = vmatpush.msrb.mxu2 %v633_v24 }
 0x1b3   : > { %v3344_v4 = vpop.eup %2441  ;;  %1517 = vadd.xlane.f32.xlu2 %v3338_v35  ;;  %1764 = vmatpush.msrb.mxu1 %v616_v33 }
 0x1b4   : > { %1551 = vadd.xlane.f32.xlu1 %v3344_v4  ;;  %v3356_v52 = vpop.eup %2443  ;;  %1805 = vmatpush.msrb.mxu2 %v632_v40 }
 0x1b5   : > { %v3359_v21 = vpop.eup %2445  ;;  %1765 = vmatpush.msrb.mxu1 %v615_v48  ;;  %1846 = vmatpush.msrb.mxu3 %v648_v55 }
 0x1b6   : > { %1806 = vmatpush.msrb.mxu2 %v631_v38 }
 0x1b7   : > { %1766 = vmatpush.msrb.mxu1 %v614_v22  ;;  %1847 = vmatpush.msrb.mxu3 %v647_v62 }
 0x1b8   : > { %1807 = vmatpush.msrb.mxu2 %v630_v27 }
 0x1b9   : > { %1767 = vmatpush.msrb.mxu1 %v613_v30  ;;  %1848 = vmatpush.msrb.mxu3 %v646_v2 }
 0x1ba   : > { %1519 = vadd.xlane.f32.xlu0 %v3356_v52  ;;  %1808 = vmatpush.msrb.mxu2 %v629_v39 }
 0x1bb   : > { %1503 = vadd.xlane.f32.xlu2 %v3359_v21  ;;  %1768 = vmatpush.msrb.mxu1 %v612_v53 }
 0x1bc   : > { %1809 = vmatpush.msrb.mxu2 %v628_v19  ;;  %1849 = vmatpush.msrb.mxu3 %v645_v56 }
 0x1bd   : > { %1769 = vmatpush.msrb.mxu1 %v611_v9 }
 0x1be   : > { %1810 = vmatpush.msrb.mxu2 %v627_v0  ;;  %1850 = vmatpush.msrb.mxu3 %v644_v57 }
 0x1c0   : > { %1851 = vmatpush.msrb.mxu3 %v643_v5 }
 0x1ce   : > { %v1490_v14 = vpop.xlane.xlu2 %1489 }
 0x1cf   : > { %2447 = vrcp.f32 %v1490_v14 }
 0x1d5   : > { %v2448_v58 = vpop.eup %2447 }
 0x1d6   : > { %v1585_v29 = vmul.f32 %v2448_v58, %v1490_v14  ;;  %v1522_v18 = vpop.xlane.xlu2 %1521  ;;  %v1506_v10 = vpop.xlane.xlu0 %1505 }
 0x1d7   : > { %2449 = vrcp.f32 %v1522_v18 }
 0x1d8   : > { %v1617_v13 = vsub.f32 2.0, %v1585_v29  ;;  %2451 = vrcp.f32 %v1506_v10 }
 0x1da   : > { %v1649_v46 = vmul.f32 %v2448_v58, %v1617_v13 }
 0x1dc   : > { %v1681_v3 = vmul.f32 %v3192_v47, %v1649_v46 }
 0x1dd   : > { %v2450_v24 = vpop.eup %2449  ;;  %v1524_v1 = vpop.xlane.xlu1 %1523 }
 0x1de   : > { %v2452_v33 = vpop.eup %2451  ;;  %v1601_v40 = vmul.f32 %v2450_v24, %v1522_v18  ;;  %2453 = vrcp.f32 %v1524_v1  ;;  %1729 = vmatmul.f32.vlgmr.msrb.gmra.mxu0 %v1681_v3  ;;  %1909 = vst [vmem:[%s3395_s27] sm:$0xff] %v1681_v3  ;;  %v1538_v25 = vpop.xlane.xlu0 %1537 }
 0x1df   : > { %v1593_v43 = vmul.f32 %v2452_v33, %v1506_v10  ;;  %2455 = vrcp.f32 %v1538_v25 }
 0x1e0   : > { %v1633_v48 = vsub.f32 2.0, %v1601_v40 }
 0x1e1   : > { %v1625_v38 = vsub.f32 2.0, %v1593_v43 }
 0x1e2   : > { %v1665_v50 = vmul.f32 %v2450_v24, %v1633_v48 }
 0x1e3   : > { %v1657_v22 = vmul.f32 %v2452_v33, %v1625_v38 }
 0x1e4   : > { %v2454_v47 = vpop.eup %2453  ;;  %v1697_v27 = vmul.f32 %v3197_v59, %v1665_v50 }
 0x1e5   : > { %v2456_v30 = vpop.eup %2455  ;;  %v1602_v63 = vmul.f32 %v2454_v47, %v1524_v1  ;;  %v1492_v39 = vpop.xlane.xlu2 %1491  ;;  %v1689_v53 = vmul.f32 %v3199_v60, %v1657_v22 }
 0x1e6   : > { %v1609_v55 = vmul.f32 %v2456_v30, %v1538_v25  ;;  %2457 = vrcp.f32 %v1492_v39  ;;  %1811 = vmatmul.f32.vlgmr.msrb.gmra.mxu2 %v1697_v27  ;;  %1925 = vst [vmem:[%s3395_s27 + $0x80] sm:$0xff] %v1697_v27  ;;  %v1508_v19 = vpop.xlane.xlu0 %1507 }
 0x1e7   : > { %v1634_v9 = vsub.f32 2.0, %v1602_v63  ;;  %1770 = vmatmul.f32.vlgmr.msrb.gmra.mxu1 %v1689_v53  ;;  %1917 = vst [vmem:[%s3395_s27 + $0x40] sm:$0xff] %v1689_v53  ;;  %2459 = vrcp.f32 %v1508_v19 }
 0x1e8   : > { %v1641_v62 = vsub.f32 2.0, %v1609_v55 }
 0x1e9   : > { %v1666_v0 = vmul.f32 %v2454_v47, %v1634_v9 }
 0x1ea   : > { %v1673_v2 = vmul.f32 %v2456_v30, %v1641_v62 }
 0x1eb   : > { %v1698_v59 = vmul.f32 %v3205_v7, %v1666_v0 }
 0x1ec   : > { %v2458_v56 = vpop.eup %2457  ;;  %v1705_v60 = vmul.f32 %v3207_v8, %v1673_v2 }
 0x1ed   : > { %v1510_v57 = vpop.xlane.xlu1 %1509  ;;  %v2460_v5 = vpop.eup %2459  ;;  %v1586_v14 = vmul.f32 %v2458_v56, %v1492_v39  ;;  %1926 = vst [vmem:[%s3395_s27 + $0x88] sm:$0xff] %v1698_v59 }
 0x1ee   : > { %v1540_v58 = vpop.xlane.xlu2 %1539  ;;  %2461 = vrcp.f32 %v1510_v57  ;;  %v1594_v29 = vmul.f32 %v2460_v5, %v1508_v19  ;;  %1814 = vmatmul.f32.gmra.mxu2 %v1698_v59  ;;  %1852 = vmatmul.f32.vlgmr.msrb.gmra.mxu3 %v1705_v60  ;;  %1933 = vst [vmem:[%s3395_s27 + $0xc0] sm:$0xff] %v1705_v60 }
 0x1ef   : > { %2463 = vrcp.f32 %v1540_v58  ;;  %v1494_v18 = vpop.xlane.xlu0 %1493  ;;  %v1618_v10 = vsub.f32 2.0, %v1586_v14 }
 0x1f0   : > { %2465 = vrcp.f32 %v1494_v18  ;;  %v1626_v13 = vsub.f32 2.0, %v1594_v29 }
 0x1f1   : > { %v1650_v7 = vmul.f32 %v2458_v56, %v1618_v10 }
 0x1f2   : > { %v1658_v46 = vmul.f32 %v2460_v5, %v1626_v13 }
 0x1f3   : > { %v1682_v8 = vmul.f32 %v3214_v26, %v1650_v7 }
 0x1f4   : > { %v2462_v3 = vpop.eup %2461  ;;  %v1690_v40 = vmul.f32 %v3216_v31, %v1658_v46 }
 0x1f5   : > { %v2464_v24 = vpop.eup %2463  ;;  %v1595_v1 = vmul.f32 %v2462_v3, %v1510_v57  ;;  %v1526_v33 = vpop.xlane.xlu1 %1525  ;;  %1732 = vmatmul.f32.gmra.mxu0 %v1682_v8  ;;  %1910 = vst [vmem:[%s3395_s27 + $0x8] sm:$0xff] %v1682_v8 }
 0x1f6   : > { %v2466_v25 = vpop.eup %2465  ;;  %v1610_v43 = vmul.f32 %v2464_v24, %v1540_v58  ;;  %v1542_v48 = vpop.xlane.xlu2 %1541  ;;  %2467 = vrcp.f32 %v1526_v33  ;;  %1773 = vmatmul.f32.gmra.mxu1 %v1690_v40  ;;  %1918 = vst [vmem:[%s3395_s27 + $0x48] sm:$0xff] %v1690_v40 }
 0x1f7   : > { %v1627_v38 = vsub.f32 2.0, %v1595_v1  ;;  %v1587_v50 = vmul.f32 %v2466_v25, %v1494_v18  ;;  %2469 = vrcp.f32 %v1542_v48  ;;  %v1544_v22 = vpop.xlane.xlu0 %1543 }
 0x1f8   : > { %v1642_v47 = vsub.f32 2.0, %v1610_v43  ;;  %2471 = vrcp.f32 %v1544_v22 }
 0x1f9   : > { %v1619_v26 = vsub.f32 2.0, %v1587_v50  ;;  %v1659_v27 = vmul.f32 %v2462_v3, %v1627_v38 }
 0x1fa   : > { %v1674_v30 = vmul.f32 %v2464_v24, %v1642_v47 }
 0x1fb   : > { %v1651_v31 = vmul.f32 %v2466_v25, %v1619_v26  ;;  %v1691_v63 = vmul.f32 %v3223_v41, %v1659_v27 }
 0x1fc   : > { %v2468_v39 = vpop.eup %2467  ;;  %v1706_v53 = vmul.f32 %v3225_v45, %v1674_v30 }
 0x1fd   : > { %v2470_v55 = vpop.eup %2469  ;;  %v1603_v19 = vmul.f32 %v2468_v39, %v1526_v33  ;;  %v1683_v9 = vmul.f32 %v3228_v37, %v1651_v31  ;;  %1919 = vst [vmem:[%s3395_s27 + $0x50] sm:$0xff] %v1691_v63  ;;  %v1496_v59 = vpop.xlane.xlu1 %1495 }
 0x1fe   : > { %v2472_v62 = vpop.eup %2471  ;;  %v1611_v0 = vmul.f32 %v2470_v55, %v1542_v48  ;;  %v1512_v2 = vpop.xlane.xlu2 %1511  ;;  %1855 = vmatmul.f32.gmra.mxu3 %v1706_v53  ;;  %1934 = vst [vmem:[%s3395_s27 + $0xc8] sm:$0xff] %v1706_v53  ;;  %1776 = vmatmul.f32.gmra.mxu1 %v1691_v63 }
 0x1ff   : > { %v1635_v56 = vsub.f32 2.0, %v1603_v19  ;;  %v1612_v57 = vmul.f32 %v2472_v62, %v1544_v22  ;;  %2473 = vrcp.f32 %v1512_v2  ;;  %1735 = vmatmul.f32.gmra.mxu0 %v1683_v9  ;;  %1911 = vst [vmem:[%s3395_s27 + $0x10] sm:$0xff] %v1683_v9  ;;  %v1514_v41 = vpop.xlane.xlu0 %1513 }
 0x200   : > { %v1643_v45 = vsub.f32 2.0, %v1611_v0  ;;  %2475 = vrcp.f32 %v1496_v59 }
 0x201   : > { %v1644_v60 = vsub.f32 2.0, %v1612_v57  ;;  %2477 = vrcp.f32 %v1514_v41  ;;  %v1667_v37 = vmul.f32 %v2468_v39, %v1635_v56 }
 0x202   : > { %v1675_v5 = vmul.f32 %v2470_v55, %v1643_v45 }
 0x203   : > { %v1699_v14 = vmul.f32 %v3235_v54, %v1667_v37  ;;  %v1676_v58 = vmul.f32 %v2472_v62, %v1644_v60 }
 0x204   : > { %v1707_v29 = vmul.f32 %v3237_v36, %v1675_v5 }
 0x205   : > { %v2474_v18 = vpop.eup %2473  ;;  %1817 = vmatmul.f32.gmra.mxu2 %v1699_v14  ;;  %1927 = vst [vmem:[%s3395_s27 + $0x90] sm:$0xff] %v1699_v14  ;;  %v1708_v10 = vmul.f32 %v3240_v61, %v1676_v58  ;;  %v1546_v3 = vpop.xlane.xlu1 %1545 }
 0x206   : > { %v2476_v13 = vpop.eup %2475  ;;  %v1596_v7 = vmul.f32 %v2474_v18, %v1512_v2  ;;  %v1528_v46 = vpop.xlane.xlu2 %1527  ;;  %1858 = vmatmul.f32.gmra.mxu3 %v1707_v29  ;;  %1935 = vst [vmem:[%s3395_s27 + $0xd0] sm:$0xff] %v1707_v29 }
 0x207   : > { %v2478_v8 = vpop.eup %2477  ;;  %v1588_v24 = vmul.f32 %v2476_v13, %v1496_v59  ;;  %2479 = vrcp.f32 %v1528_v46  ;;  %v1530_v1 = vpop.xlane.xlu0 %1529  ;;  %1936 = vst [vmem:[%s3395_s27 + $0xd8] sm:$0xff] %v1708_v10 }
 0x208   : > { %v1628_v54 = vsub.f32 2.0, %v1596_v7  ;;  %v1597_v33 = vmul.f32 %v2478_v8, %v1514_v41  ;;  %2481 = vrcp.f32 %v1546_v3 }
 0x209   : > { %v1620_v36 = vsub.f32 2.0, %v1588_v24  ;;  %2483 = vrcp.f32 %v1530_v1 }
 0x20a   : > { %v1629_v40 = vsub.f32 2.0, %v1597_v33  ;;  %v1660_v25 = vmul.f32 %v2474_v18, %v1628_v54 }
 0x20b   : > { %v1652_v61 = vmul.f32 %v2476_v13, %v1620_v36 }
 0x20c   : > { %v1692_v43 = vmul.f32 %v3247_v6, %v1660_v25  ;;  %v1661_v48 = vmul.f32 %v2478_v8, %v1629_v40 }
 0x20d   : > { %v2480_v38 = vpop.eup %2479  ;;  %v1684_v50 = vmul.f32 %v3249_v15, %v1652_v61  ;;  %v1516_v27 = vpop.xlane.xlu1 %1515 }
 0x20e   : > { %v2482_v22 = vpop.eup %2481  ;;  %v1604_v47 = vmul.f32 %v2480_v38, %v1528_v46  ;;  %v1498_v26 = vpop.xlane.xlu2 %1497  ;;  %1779 = vmatmul.f32.gmra.mxu1 %v1692_v43  ;;  %1920 = vst [vmem:[%s3395_s27 + $0x58] sm:$0xff] %v1692_v43  ;;  %1861 = vmatmul.f32.gmra.mxu3 %v1708_v10  ;;  %v1693_v30 = vmul.f32 %v3251_v16, %v1661_v48 }
 0x20f   : > { %v2484_v31 = vpop.eup %2483  ;;  %v1613_v63 = vmul.f32 %v2482_v22, %v1546_v3  ;;  %2485 = vrcp.f32 %v1498_v26  ;;  %1738 = vmatmul.f32.gmra.mxu0 %v1684_v50  ;;  %1912 = vst [vmem:[%s3395_s27 + $0x18] sm:$0xff] %v1684_v50  ;;  %v1500_v6 = vpop.xlane.xlu0 %1499 }
 0x210   : > { %v1636_v39 = vsub.f32 2.0, %v1604_v47  ;;  %v1605_v53 = vmul.f32 %v2484_v31, %v1530_v1  ;;  %2487 = vrcp.f32 %v1516_v27  ;;  %1921 = vst [vmem:[%s3395_s27 + $0x60] sm:$0xff] %v1693_v30 }
 0x211   : > { %v1645_v15 = vsub.f32 2.0, %v1613_v63  ;;  %2489 = vrcp.f32 %v1500_v6 }
 0x212   : > { %v1637_v55 = vsub.f32 2.0, %v1605_v53  ;;  %v1668_v19 = vmul.f32 %v2480_v38, %v1636_v39 }
 0x213   : > { %v1677_v9 = vmul.f32 %v2482_v22, %v1645_v15 }
 0x214   : > { %v1700_v62 = vmul.f32 %v3261_v34, %v1668_v19  ;;  %v1669_v16 = vmul.f32 %v2484_v31, %v1637_v55 }
 0x215   : > { %v2486_v0 = vpop.eup %2485  ;;  %v1709_v2 = vmul.f32 %v3259_v20, %v1677_v9  ;;  %v1532_v41 = vpop.xlane.xlu1 %1531 }
 0x216   : > { %v2488_v59 = vpop.eup %2487  ;;  %v1589_v56 = vmul.f32 %v2486_v0, %v1498_v26  ;;  %v1548_v57 = vpop.xlane.xlu2 %1547  ;;  %1820 = vmatmul.f32.gmra.mxu2 %v1700_v62  ;;  %1928 = vst [vmem:[%s3395_s27 + $0x98] sm:$0xff] %v1700_v62  ;;  %1782 = vmatmul.f32.gmra.mxu1 %v1693_v30  ;;  %v1701_v45 = vmul.f32 %v3263_v11, %v1669_v16 }
 0x217   : > { %v2490_v60 = vpop.eup %2489  ;;  %v1598_v37 = vmul.f32 %v2488_v59, %v1516_v27  ;;  %2491 = vrcp.f32 %v1548_v57  ;;  %1864 = vmatmul.f32.gmra.mxu3 %v1709_v2  ;;  %1937 = vst [vmem:[%s3395_s27 + $0xe0] sm:$0xff] %v1709_v2  ;;  %v1550_v34 = vpop.xlane.xlu0 %1549 }
 0x218   : > { %v1621_v5 = vsub.f32 2.0, %v1589_v56  ;;  %v1590_v14 = vmul.f32 %v2490_v60, %v1500_v6  ;;  %2493 = vrcp.f32 %v1532_v41  ;;  %1929 = vst [vmem:[%s3395_s27 + $0xa0] sm:$0xff] %v1701_v45 }
 0x219   : > { %v1630_v20 = vsub.f32 2.0, %v1598_v37  ;;  %2495 = vrcp.f32 %v1550_v34 }
 0x21a   : > { %v1622_v58 = vsub.f32 2.0, %v1590_v14  ;;  %v1653_v29 = vmul.f32 %v2486_v0, %v1621_v5 }
 0x21b   : > { %v1662_v18 = vmul.f32 %v2488_v59, %v1630_v20 }
 0x21c   : > { %v1685_v10 = vmul.f32 %v3280_v49, %v1653_v29  ;;  %v1654_v11 = vmul.f32 %v2490_v60, %v1622_v58 }
 0x21d   : > { %v2492_v13 = vpop.eup %2491  ;;  %v1694_v7 = vmul.f32 %v3277_v42, %v1662_v18  ;;  %v1502_v24 = vpop.xlane.xlu1 %1501 }
 0x21e   : > { %v2494_v46 = vpop.eup %2493  ;;  %v1614_v3 = vmul.f32 %v2492_v13, %v1548_v57  ;;  %v1534_v8 = vpop.xlane.xlu2 %1533  ;;  %1741 = vmatmul.f32.gmra.mxu0 %v1685_v10  ;;  %1913 = vst [vmem:[%s3395_s27 + $0x20] sm:$0xff] %v1685_v10  ;;  %1823 = vmatmul.f32.gmra.mxu2 %v1701_v45  ;;  %v1686_v1 = vmul.f32 %v3282_v32, %v1654_v11 }
 0x21f   : > { %v2496_v54 = vpop.eup %2495  ;;  %v1606_v33 = vmul.f32 %v2494_v46, %v1532_v41  ;;  %2497 = vrcp.f32 %v1534_v8  ;;  %1785 = vmatmul.f32.gmra.mxu1 %v1694_v7  ;;  %1922 = vst [vmem:[%s3395_s27 + $0x68] sm:$0xff] %v1694_v7 }
 0x220   : > { %v1646_v49 = vsub.f32 2.0, %v1614_v3  ;;  %v1615_v36 = vmul.f32 %v2496_v54, %v1550_v34  ;;  %2499 = vrcp.f32 %v1502_v24  ;;  %1914 = vst [vmem:[%s3395_s27 + $0x28] sm:$0xff] %v1686_v1 }
 0x221   : > { %v1638_v42 = vsub.f32 2.0, %v1606_v33 }
 0x222   : > { %v1647_v40 = vsub.f32 2.0, %v1615_v36  ;;  %v1678_v25 = vmul.f32 %v2492_v13, %v1646_v49 }
 0x223   : > { %v1670_v61 = vmul.f32 %v2494_v46, %v1638_v42 }
 0x224   : > { %v1710_v43 = vmul.f32 %v3307_v12, %v1678_v25  ;;  %v1679_v48 = vmul.f32 %v2496_v54, %v1647_v40 }
 0x225   : > { %v2498_v38 = vpop.eup %2497  ;;  %v1702_v32 = vmul.f32 %v3304_v28, %v1670_v61  ;;  %v1536_v50 = vpop.xlane.xlu0 %1535 }
 0x226   : > { %v2500_v22 = vpop.eup %2499  ;;  %v1607_v47 = vmul.f32 %v2498_v38, %v1534_v8  ;;  %v1518_v26 = vpop.xlane.xlu2 %1517  ;;  %1744 = vmatmul.f32.gmra.mxu0 %v1686_v1  ;;  %1867 = vmatmul.f32.gmra.mxu3 %v1710_v43  ;;  %1938 = vst [vmem:[%s3395_s27 + $0xe8] sm:$0xff] %v1710_v43  ;;  %2501 = vrcp.f32 %v1536_v50  ;;  %v1711_v27 = vmul.f32 %v3311_v23, %v1679_v48 }
 0x227   : > { %v1591_v30 = vmul.f32 %v2500_v22, %v1502_v24  ;;  %2503 = vrcp.f32 %v1518_v26  ;;  %1826 = vmatmul.f32.gmra.mxu2 %v1702_v32  ;;  %1930 = vst [vmem:[%s3395_s27 + $0xa8] sm:$0xff] %v1702_v32  ;;  %v1552_v12 = vpop.xlane.xlu1 %1551 }
 0x228   : > { %v1639_v31 = vsub.f32 2.0, %v1607_v47  ;;  %2505 = vrcp.f32 %v1552_v12  ;;  %1939 = vst [vmem:[%s3395_s27 + $0xf0] sm:$0xff] %v1711_v27 }
 0x229   : > { %v1623_v28 = vsub.f32 2.0, %v1591_v30 }
 0x22a   : > { %v1671_v63 = vmul.f32 %v2498_v38, %v1639_v31 }
 0x22b   : > { %v1655_v6 = vmul.f32 %v2500_v22, %v1623_v28 }
 0x22c   : > { %v2502_v39 = vpop.eup %2501  ;;  %v1703_v53 = vmul.f32 %v3327_v51, %v1671_v63 }
 0x22d   : > { %v2504_v15 = vpop.eup %2503  ;;  %v1608_v55 = vmul.f32 %v2502_v39, %v1536_v50  ;;  %v1687_v23 = vmul.f32 %v3323_v44, %v1655_v6  ;;  %v1520_v19 = vpop.xlane.xlu0 %1519 }
 0x22e   : > { %v2506_v9 = vpop.eup %2505  ;;  %v1599_v62 = vmul.f32 %v2504_v15, %v1518_v26  ;;  %v1504_v16 = vpop.xlane.xlu2 %1503  ;;  %1931 = vst [vmem:[%s3395_s27 + $0xb0] sm:$0xff] %v1703_v53  ;;  %1870 = vmatmul.f32.gmra.mxu3 %v1711_v27  ;;  %2507 = vrcp.f32 %v1520_v19 }
 0x22f   : > { %v1640_v0 = vsub.f32 2.0, %v1608_v55  ;;  %v1616_v2 = vmul.f32 %v2506_v9, %v1552_v12  ;;  %2509 = vrcp.f32 %v1504_v16  ;;  %1747 = vmatmul.f32.gmra.mxu0 %v1687_v23  ;;  %1915 = vst [vmem:[%s3395_s27 + $0x30] sm:$0xff] %v1687_v23  ;;  %1829 = vmatmul.f32.gmra.mxu2 %v1703_v53 }
 0x230   : > { %v1631_v51 = vsub.f32 2.0, %v1599_v62 }
 0x231   : > { %v1648_v59 = vsub.f32 2.0, %v1616_v2  ;;  %v1672_v56 = vmul.f32 %v2502_v39, %v1640_v0 }
 0x232   : > { %v1663_v44 = vmul.f32 %v2504_v15, %v1631_v51 }
 0x233   : > { %v1680_v57 = vmul.f32 %v2506_v9, %v1648_v59  ;;  %v1704_v41 = vmul.f32 %v3336_v17, %v1672_v56 }
 0x234   : > { %v2508_v45 = vpop.eup %2507  ;;  %v1695_v60 = vmul.f32 %v3338_v35, %v1663_v44 }
 0x235   : > { %v2510_v37 = vpop.eup %2509  ;;  %v1600_v34 = vmul.f32 %v2508_v45, %v1520_v19  ;;  %1932 = vst [vmem:[%s3395_s27 + $0xb8] sm:$0xff] %v1704_v41  ;;  %v1712_v5 = vmul.f32 %v3344_v4, %v1680_v57 }
 0x236   : > { %v1592_v14 = vmul.f32 %v2510_v37, %v1504_v16  ;;  %1788 = vmatmul.f32.gmra.mxu1 %v1695_v60  ;;  %1923 = vst [vmem:[%s3395_s27 + $0x70] sm:$0xff] %v1695_v60 }
 0x237   : > { %v1632_v20 = vsub.f32 2.0, %v1600_v34  ;;  %1832 = vmatmul.f32.gmra.mxu2 %v1704_v41  ;;  %1873 = vmatmul.f32.gmra.mxu3 %v1712_v5  ;;  %1940 = vst [vmem:[%s3395_s27 + $0xf8] sm:$0xff] %v1712_v5 }
 0x238   : > { %v1624_v17 = vsub.f32 2.0, %v1592_v14 }
 0x239   : > { %v1664_v58 = vmul.f32 %v2508_v45, %v1632_v20 }
 0x23a   : > { %v1656_v29 = vmul.f32 %v2510_v37, %v1624_v17 }
 0x23b   : > { %v1696_v35 = vmul.f32 %v3356_v52, %v1664_v58 }
 0x23c   : > { %v1688_v4 = vmul.f32 %v3359_v21, %v1656_v29 }
 0x23d   : > { %1924 = vst [vmem:[%s3395_s27 + $0x78] sm:$0xff] %v1696_v35 }
 0x23e   : > { %1750 = vmatmul.f32.gmra.mxu0 %v1688_v4  ;;  %1916 = vst [vmem:[%s3395_s27 + $0x38] sm:$0xff] %v1688_v4  ;;  %1791 = vmatmul.f32.gmra.mxu1 %v1696_v35 }
 0x23f   : > { %2538 = shalt.err (!%p2535_p5)
}
 0x240   : > { %s2592_s12 = smov 128   ;;  %s2593_s27 = smov 8  }
 0x241   : > { %2325 = dma.vmem_to_hbm [thread:$0]  (%p2669_p4), %s1979_s14, 4096, %s1981_s15, %s1956_s17, %s2592_s12, %s2592_s12, %s2593_s27  }
 0x242   : > { %s3482_s19 = scalar_lea.vmem %s3575_s5, %s2318_s16 }
 0x25b   : > { %v1730_v52 = vpop.f32.mrf.mxu0 }
 0x25c   : > { %1877 = vst.msk [vmem:[%s3482_s19] sm:$0xff] %vm691_vm0, %v1730_v52 }
 0x264   : > { %v1771_v21 = vpop.f32.mrf.mxu1 }
 0x265   : > { %1885 = vst.msk [vmem:[%s3482_s19 + $0x40] sm:$0xff] %vm691_vm0, %v1771_v21 }
 0x269   : > { %v1812_v18 = vpop.f32.mrf.mxu2 }
 0x26a   : > { %1893 = vst.msk [vmem:[%s3482_s19 + $0x80] sm:$0xff] %vm691_vm0, %v1812_v18 }
 0x271   : > { %v1815_v10 = vpop.f32.mrf.mxu2  ;;  %v1853_v11 = vpop.f32.mrf.mxu3 }
 0x272   : > { %v1733_v13 = vpop.f32.mrf.mxu0  ;;  %1894 = vst.msk [vmem:[%s3482_s19 + $0x88] sm:$0xff] %vm691_vm0, %v1815_v10 }
 0x273   : > { %1878 = vst.msk [vmem:[%s3482_s19 + $0x8] sm:$0xff] %vm691_vm0, %v1733_v13  ;;  %v1774_v7 = vpop.f32.mrf.mxu1 }
 0x274   : > { %1901 = vst.msk [vmem:[%s3482_s19 + $0xc0] sm:$0xff] %vm691_vm0, %v1853_v11 }
 0x275   : > { %1886 = vst.msk [vmem:[%s3482_s19 + $0x48] sm:$0xff] %vm691_vm0, %v1774_v7 }
 0x27b   : > { %v1777_v3 = vpop.f32.mrf.mxu1 }
 0x27c   : > { %v1736_v46 = vpop.f32.mrf.mxu0  ;;  %1887 = vst.msk [vmem:[%s3482_s19 + $0x50] sm:$0xff] %vm691_vm0, %v1777_v3 }
 0x27d   : > { %1879 = vst.msk [vmem:[%s3482_s19 + $0x10] sm:$0xff] %vm691_vm0, %v1736_v46 }
 0x281   : > { %v1856_v8 = vpop.f32.mrf.mxu3 }
 0x282   : > { %1902 = vst.msk [vmem:[%s3482_s19 + $0xc8] sm:$0xff] %vm691_vm0, %v1856_v8 }
 0x288   : > { %v1818_v24 = vpop.f32.mrf.mxu2 }
 0x289   : > { %1895 = vst.msk [vmem:[%s3482_s19 + $0x90] sm:$0xff] %vm691_vm0, %v1818_v24  ;;  %v1859_v1 = vpop.f32.mrf.mxu3 }
 0x28a   : > { %1903 = vst.msk [vmem:[%s3482_s19 + $0xd0] sm:$0xff] %vm691_vm0, %v1859_v1 }
 0x28b   : > { %v1780_v54 = vpop.f32.mrf.mxu1 }
 0x28c   : > { %v1739_v33 = vpop.f32.mrf.mxu0  ;;  %1888 = vst.msk [vmem:[%s3482_s19 + $0x58] sm:$0xff] %vm691_vm0, %v1780_v54 }
 0x28d   : > { %1880 = vst.msk [vmem:[%s3482_s19 + $0x18] sm:$0xff] %vm691_vm0, %v1739_v33 }
 0x291   : > { %v1862_v49 = vpop.f32.mrf.mxu3 }
 0x292   : > { %1904 = vst.msk [vmem:[%s3482_s19 + $0xd8] sm:$0xff] %vm691_vm0, %v1862_v49 }
 0x293   : > { %v1783_v36 = vpop.f32.mrf.mxu1 }
 0x294   : > { %1889 = vst.msk [vmem:[%s3482_s19 + $0x60] sm:$0xff] %vm691_vm0, %v1783_v36 }
 0x299   : > { %v1821_v42 = vpop.f32.mrf.mxu2 }
 0x29a   : > { %1896 = vst.msk [vmem:[%s3482_s19 + $0x98] sm:$0xff] %vm691_vm0, %v1821_v42  ;;  %v1865_v40 = vpop.f32.mrf.mxu3 }
 0x29b   : > { %1905 = vst.msk [vmem:[%s3482_s19 + $0xe0] sm:$0xff] %vm691_vm0, %v1865_v40  ;;  %v1742_v25 = vpop.f32.mrf.mxu0 }
 0x29c   : > { %1881 = vst.msk [vmem:[%s3482_s19 + $0x20] sm:$0xff] %vm691_vm0, %v1742_v25  ;;  %v1786_v61 = vpop.f32.mrf.mxu1 }
 0x29d   : > { %1890 = vst.msk [vmem:[%s3482_s19 + $0x68] sm:$0xff] %vm691_vm0, %v1786_v61 }
 0x2a1   : > { %v1824_v43 = vpop.f32.mrf.mxu2 }
 0x2a2   : > { %1897 = vst.msk [vmem:[%s3482_s19 + $0xa0] sm:$0xff] %vm691_vm0, %v1824_v43 }
 0x2a3   : > { %v1745_v48 = vpop.f32.mrf.mxu0 }
 0x2a4   : > { %1882 = vst.msk [vmem:[%s3482_s19 + $0x28] sm:$0xff] %vm691_vm0, %v1745_v48 }
 0x2a9   : > { %v1868_v38 = vpop.f32.mrf.mxu3 }
 0x2aa   : > { %v1827_v32 = vpop.f32.mrf.mxu2  ;;  %1906 = vst.msk [vmem:[%s3482_s19 + $0xe8] sm:$0xff] %vm691_vm0, %v1868_v38 }
 0x2ab   : > { %1898 = vst.msk [vmem:[%s3482_s19 + $0xa8] sm:$0xff] %vm691_vm0, %v1827_v32 }
 0x2ac   : > { %v1748_v50 = vpop.f32.mrf.mxu0 }
 0x2ad   : > { %1883 = vst.msk [vmem:[%s3482_s19 + $0x30] sm:$0xff] %vm691_vm0, %v1748_v50 }
 0x2b1   : > { %v1871_v22 = vpop.f32.mrf.mxu3 }
 0x2b2   : > { %v1830_v47 = vpop.f32.mrf.mxu2  ;;  %1907 = vst.msk [vmem:[%s3482_s19 + $0xf0] sm:$0xff] %vm691_vm0, %v1871_v22 }
 0x2b3   : > { %1899 = vst.msk [vmem:[%s3482_s19 + $0xb0] sm:$0xff] %vm691_vm0, %v1830_v47  ;;  %v1789_v26 = vpop.f32.mrf.mxu1 }
 0x2b4   : > { %1891 = vst.msk [vmem:[%s3482_s19 + $0x70] sm:$0xff] %vm691_vm0, %v1789_v26 }
 0x2ba   : > { %v1833_v27 = vpop.f32.mrf.mxu2  ;;  %v1874_v30 = vpop.f32.mrf.mxu3 }
 0x2bb   : > { %1900 = vst.msk [vmem:[%s3482_s19 + $0xb8] sm:$0xff] %vm691_vm0, %v1833_v27  ;;  %v1751_v12 = vpop.f32.mrf.mxu0  ;;  %v1792_v31 = vpop.f32.mrf.mxu1 }
 0x2bc   : > { %1884 = vst.msk [vmem:[%s3482_s19 + $0x38] sm:$0xff] %vm691_vm0, %v1751_v12 }
 0x2bd   : > { %1892 = vst.msk [vmem:[%s3482_s19 + $0x78] sm:$0xff] %vm691_vm0, %v1792_v31 }
 0x2be   : > { %1908 = vst.msk [vmem:[%s3482_s19 + $0xf8] sm:$0xff] %vm691_vm0, %v1874_v30 }
 0x2bf PF: > { %p2331_p4 = scmp.ge.s32.totalorder %s2589_s26, 2  ;;  %s2012_s0 = sand.u32 1, %s2569_s21  }
 0x2c0   : > { %s2013_s7 = scalar_lea.sflag [#allocation3], %s2012_s0 }
 0x2c1   : > { %p2328_p6 = pnand %p2331_p4, %p2676_p8 }
 0x2c3   : > { %p2329_p7 = pneg %p2328_p6 }
 0x2c5   : > { %2564 = dma.done.wait (%p2329_p7), %s2013_s7, 4096  }
 0x2c6   : > { %2566 = vsyncadd (%p2329_p7), %s2013_s7, 4294963200  ;;  %s20_s26 = sadd.s32 1, %s2589_s26   ;;  %s3597_s21 = smov %s2573_s22 }
 0x2c7   : > { %p17_p9 = scmp.ge.s32.totalorder %s20_s26, 4   ;;  %s3598_s22 = smov %s2577_s23 }
 0x2c8   : > { %s3599_s23 = smov %s2682_s10  ;;  %s3600_s24 = smov %s2585_s25 }
 0x2c9   : > { %s3601_s25 = smov %s3603_s29  ;;  %19 = sbr.rel (!%p17_p9) target bundleno = 6 (0x6), region = 99 }
 0x2ce   :  { %2019 = vsyncpa [#allocation3], 1 }
 0x2cf   :  { %2021 = vsyncpa [#allocation3 + $0x1], 1 }

</bundles_post_ra>
